<compile_context>
chip_gen: v7x
topology: tpu7x:2x2x1
jax: 0.10.0
libtpu: 0.0.40
codegen_flags: <defaults>
</compile_context>

<pallas_src>
import jax
import jax.numpy as jnp
from jax.experimental import pallas as pl
from jax.experimental.pallas import tpu as pltpu

# Layer sizes from Net2.__init__
IN_DIM = 32          # `input_shape` constructor arg (chosen small & TPU-friendly)
DIMS = [IN_DIM, 128, 256, 64, 32, 8, 1]
OUT_PAD = 8          # final layer padded 1 -> 8 columns (block last dim == array dim)
LARGE_TILE = 4096    # default batch tile for large batches (fits v7x 64 MiB VMEM easily)


def mlp_kernel(x_ref,
               w1_ref, b1_ref,
               w2_ref, b2_ref,
               w3_ref, b3_ref,
               w4_ref, b4_ref,
               w5_ref, b5_ref,
               w6_ref, b6_ref,
               o_ref):
    # x arrives as bf16; weights are bf16; biases are f32.
    # MXU: bf16 x bf16 -> f32 accumulate.  VPU (bias/ReLU/sigmoid): f32.
    h = x_ref[...]                                                    # (tile, 32) bf16

    def layer_relu(h_bf16, w_ref, b_ref):
        z = jnp.dot(h_bf16, w_ref[...],
                    preferred_element_type=jnp.float32) + b_ref[...]  # f32
        return jnp.maximum(z, 0.0)                                    # f32

    h = layer_relu(h, w1_ref, b1_ref)                        # (tile, 128) f32
    h = layer_relu(h.astype(jnp.bfloat16), w2_ref, b2_ref)   # (tile, 256)
    h = layer_relu(h.astype(jnp.bfloat16), w3_ref, b3_ref)   # (tile, 64)
    h = layer_relu(h.astype(jnp.bfloat16), w4_ref, b4_ref)   # (tile, 32)
    h = layer_relu(h.astype(jnp.bfloat16), w5_ref, b5_ref)   # (tile, 8)

    # fc6 (padded to 8 output columns; column 0 is the real one) + sigmoid.
    # TODO(synk): a fully lane-dense (tile//128, 128) single-column store would
    # shave the remaining 28 B/row of padded writeback, but needs a
    # sublane->lane relayout; skipped to keep lowering robust.
    z = jnp.dot(h.astype(jnp.bfloat16), w6_ref[...],
                preferred_element_type=jnp.float32) + b6_ref[...]     # (tile, 8) f32
    o_ref[...] = jax.nn.sigmoid(z).astype(o_ref.dtype)


def _prepare_params(params):
    """Cast weights to bf16, keep biases f32, pad final layer's out-dim to OUT_PAD."""
    flat = []
    n = len(params)
    for li, (w, b) in enumerate(params):
        if li == n - 1:
            w = jnp.pad(w, ((0, 0), (0, OUT_PAD - w.shape[1])))
            b = jnp.pad(b, ((0, 0), (0, OUT_PAD - b.shape[1])))
        flat.append(w.astype(jnp.bfloat16))
        flat.append(b.astype(jnp.float32))
    return flat


def _round_up(n, m):
    return ((n + m - 1) // m) * m


def _pick_batch_tile(B):
    """Multiple of 256, capped at LARGE_TILE, >= 2 grid steps when B allows it."""
    if B <= 256:
        return 256
    if B <= 2 * LARGE_TILE:
        return min(LARGE_TILE, _round_up(pl.cdiv(B, 2), 256))
    return LARGE_TILE


def net2_forward(x, params, *, batch_tile=None):
    """x: (B, IN_DIM) float32. params: list of (w, b) per layer, w: (in, out), b: (1, out)."""
    B = x.shape[0]
    if batch_tile is None:
        batch_tile = _pick_batch_tile(B)
    num_tiles = pl.cdiv(B, batch_tile)
    B_pad = num_tiles * batch_tile
    if B_pad != B:
        x = jnp.pad(x, ((0, B_pad - B), (0, 0)))        # remainder tile via zero-padding
    x = x.astype(jnp.bfloat16)                           # halves the only large HBM read

    flat = _prepare_params(params)

    # x is tiled over the batch; every weight/bias uses its full array as one block
    # with a constant index_map, so it is fetched once and stays resident in VMEM.
    in_specs = [pl.BlockSpec((batch_tile, IN_DIM), lambda i: (i, 0))]
    for arr in flat:
        in_specs.append(pl.BlockSpec(arr.shape, lambda i: (0, 0)))

    out_spec = pl.BlockSpec((batch_tile, OUT_PAD), lambda i: (i, 0))

    out_padded = pl.pallas_call(
        mlp_kernel,
        out_shape=jax.ShapeDtypeStruct((B_pad, OUT_PAD), jnp.float32),
        grid_spec=pltpu.PrefetchScalarGridSpec(
            num_scalar_prefetch=0,
            grid=(num_tiles,),
            in_specs=in_specs,
            out_specs=out_spec,
        ),
        compiler_params=pltpu.CompilerParams(
            dimension_semantics=("parallel",),       # batch axis is independent
            vmem_limit_bytes=32 * 1024 * 1024,       # headroom for the 4096-row tile
        ),
    )(x, *flat)

    return out_padded[:B, :1]


def init_params(key):
    """Deterministic init matching nn.Linear's U(-1/sqrt(fan_in), 1/sqrt(fan_in))."""
    params = []
    for i in range(len(DIMS) - 1):
        fan_in, fan_out = DIMS[i], DIMS[i + 1]
        key, kw, kb = jax.random.split(key, 3)
        bound = 1.0 / jnp.sqrt(jnp.float32(fan_in))
        # stored as (in, out) so the kernel can do x @ w directly
        w = jax.random.uniform(kw, (fan_in, fan_out), jnp.float32, -bound, bound)
        b = jax.random.uniform(kb, (1, fan_out), jnp.float32, -bound, bound)
        params.append((w, b))
    return params


def net2_reference_f32(x, params):
    h = x
    for w, b in params[:-1]:
        h = jnp.maximum(h @ w + b, 0.0)
    w, b = params[-1]
    return jax.nn.sigmoid(h @ w + b)


def net2_reference_bf16(x, params):
    """Reference with the same bf16-input / f32-accumulate matmuls as the kernel."""
    h = x.astype(jnp.bfloat16)
    for w, b in params[:-1]:
        z = jnp.dot(h, w.astype(jnp.bfloat16),
                    preferred_element_type=jnp.float32) + b
        h = jnp.maximum(z, 0.0).astype(jnp.bfloat16)
    w, b = params[-1]
    z = jnp.dot(h, w.astype(jnp.bfloat16),
                preferred_element_type=jnp.float32) + b
    return jax.nn.sigmoid(z)


if __name__ == "__main__":
    key = jax.random.PRNGKey(0)
    key, kx = jax.random.split(key)

    B = 300   # intentionally not a multiple of the tile, to exercise batch padding
    x = jax.random.normal(kx, (B, IN_DIM), jnp.float32)
    params = init_params(key)

    out = net2_forward(x, params)            # auto tile -> 256 rows, 2 grid steps
    out = jax.block_until_ready(out)

    assert out.shape == (B, 1), out.shape

    ref_bf16 = net2_reference_bf16(x, params)
    ref_f32 = net2_reference_f32(x, params)
    assert jnp.allclose(out, ref_bf16, atol=2e-3, rtol=2e-3), "mismatch vs bf16 reference"
    assert jnp.allclose(out, ref_f32, atol=5e-2, rtol=5e-2), "mismatch vs f32 reference"

    print("KERNEL_OK")
</pallas_src>

<mosaic_0001>
module attributes {stable_mosaic.version = 11 : i64} {
  func.func @mlp_kernel(%arg0: i32, %arg1: memref<256x32xbf16, #tpu.memory_space<vmem>>, %arg2: memref<32x128xbf16, #tpu.memory_space<vmem>>, %arg3: memref<1x128xf32, #tpu.memory_space<vmem>>, %arg4: memref<128x256xbf16, #tpu.memory_space<vmem>>, %arg5: memref<1x256xf32, #tpu.memory_space<vmem>>, %arg6: memref<256x64xbf16, #tpu.memory_space<vmem>>, %arg7: memref<1x64xf32, #tpu.memory_space<vmem>>, %arg8: memref<64x32xbf16, #tpu.memory_space<vmem>>, %arg9: memref<1x32xf32, #tpu.memory_space<vmem>>, %arg10: memref<32x8xbf16, #tpu.memory_space<vmem>>, %arg11: memref<1x8xf32, #tpu.memory_space<vmem>>, %arg12: memref<8x8xbf16, #tpu.memory_space<vmem>>, %arg13: memref<1x8xf32, #tpu.memory_space<vmem>>, %arg14: memref<256x8xf32, #tpu.memory_space<vmem>>) attributes {dimension_semantics = [#tpu.dimension_semantics<parallel>], iteration_bounds = array<i64: 2>, scalar_prefetch = 0 : i64, scratch_operands = 0 : i64, tpu.core_type = #tpu.core_type<tc>, window_params = [{transform_indices = @transform_0, window_bounds = array<i64: 256, 32>}, {pipeline_mode = #tpu.pipeline_mode<synchronous>, transform_indices = @transform_1, window_bounds = array<i64: 32, 128>}, {pipeline_mode = #tpu.pipeline_mode<synchronous>, transform_indices = @transform_2, window_bounds = array<i64: 1, 128>}, {pipeline_mode = #tpu.pipeline_mode<synchronous>, transform_indices = @transform_3, window_bounds = array<i64: 128, 256>}, {pipeline_mode = #tpu.pipeline_mode<synchronous>, transform_indices = @transform_4, window_bounds = array<i64: 1, 256>}, {pipeline_mode = #tpu.pipeline_mode<synchronous>, transform_indices = @transform_5, window_bounds = array<i64: 256, 64>}, {pipeline_mode = #tpu.pipeline_mode<synchronous>, transform_indices = @transform_6, window_bounds = array<i64: 1, 64>}, {pipeline_mode = #tpu.pipeline_mode<synchronous>, transform_indices = @transform_7, window_bounds = array<i64: 64, 32>}, {pipeline_mode = #tpu.pipeline_mode<synchronous>, transform_indices = @transform_8, window_bounds = array<i64: 1, 32>}, {pipeline_mode = #tpu.pipeline_mode<synchronous>, transform_indices = @transform_9, window_bounds = array<i64: 32, 8>}, {pipeline_mode = #tpu.pipeline_mode<synchronous>, transform_indices = @transform_10, window_bounds = array<i64: 1, 8>}, {pipeline_mode = #tpu.pipeline_mode<synchronous>, transform_indices = @transform_11, window_bounds = array<i64: 8, 8>}, {pipeline_mode = #tpu.pipeline_mode<synchronous>, transform_indices = @transform_12, window_bounds = array<i64: 1, 8>}, {transform_indices = @transform_13, window_bounds = array<i64: 256, 8>}]} {
    %c0 = arith.constant 0 : index
    %c0_0 = arith.constant 0 : index
    %0 = vector.load %arg1[%c0, %c0_0] : memref<256x32xbf16, #tpu.memory_space<vmem>>, vector<256x32xbf16>
    %c0_1 = arith.constant 0 : index
    %c0_2 = arith.constant 0 : index
    %1 = vector.load %arg2[%c0_1, %c0_2] : memref<32x128xbf16, #tpu.memory_space<vmem>>, vector<32x128xbf16>
    %cst = arith.constant dense<0.000000e+00> : vector<256x128xf32>
    %2 = tpu.matmul %0, %1, %cst {dimension_numbers = #tpu.dot_dimension_numbers<[1], [0], [0], [1], [0, 0, 1, 1], [], []>} : vector<256x32xbf16>, vector<32x128xbf16>, vector<256x128xf32> -> vector<256x128xf32>
    %c0_3 = arith.constant 0 : index
    %c0_4 = arith.constant 0 : index
    %3 = vector.load %arg3[%c0_3, %c0_4] : memref<1x128xf32, #tpu.memory_space<vmem>>, vector<1x128xf32>
    %4 = vector.broadcast %3 : vector<1x128xf32> to vector<256x128xf32>
    %5 = arith.addf %2, %4 : vector<256x128xf32>
    %cst_5 = arith.constant 0.000000e+00 : f32
    %6 = vector.broadcast %cst_5 : f32 to vector<256x128xf32>
    %7 = arith.maximumf %5, %6 : vector<256x128xf32>
    %8 = arith.truncf %7 : vector<256x128xf32> to vector<256x128xbf16>
    %c0_6 = arith.constant 0 : index
    %c0_7 = arith.constant 0 : index
    %9 = vector.load %arg4[%c0_6, %c0_7] : memref<128x256xbf16, #tpu.memory_space<vmem>>, vector<128x256xbf16>
    %cst_8 = arith.constant dense<0.000000e+00> : vector<256x256xf32>
    %10 = tpu.matmul %8, %9, %cst_8 {dimension_numbers = #tpu.dot_dimension_numbers<[1], [0], [0], [1], [0, 0, 1, 1], [], []>} : vector<256x128xbf16>, vector<128x256xbf16>, vector<256x256xf32> -> vector<256x256xf32>
    %c0_9 = arith.constant 0 : index
    %c0_10 = arith.constant 0 : index
    %11 = vector.load %arg5[%c0_9, %c0_10] : memref<1x256xf32, #tpu.memory_space<vmem>>, vector<1x256xf32>
    %12 = vector.broadcast %11 : vector<1x256xf32> to vector<256x256xf32>
    %13 = arith.addf %10, %12 : vector<256x256xf32>
    %cst_11 = arith.constant 0.000000e+00 : f32
    %14 = vector.broadcast %cst_11 : f32 to vector<256x256xf32>
    %15 = arith.maximumf %13, %14 : vector<256x256xf32>
    %16 = arith.truncf %15 : vector<256x256xf32> to vector<256x256xbf16>
    %c0_12 = arith.constant 0 : index
    %c0_13 = arith.constant 0 : index
    %17 = vector.load %arg6[%c0_12, %c0_13] : memref<256x64xbf16, #tpu.memory_space<vmem>>, vector<256x64xbf16>
    %cst_14 = arith.constant dense<0.000000e+00> : vector<256x64xf32>
    %18 = tpu.matmul %16, %17, %cst_14 {dimension_numbers = #tpu.dot_dimension_numbers<[1], [0], [0], [1], [0, 0, 1, 1], [], []>} : vector<256x256xbf16>, vector<256x64xbf16>, vector<256x64xf32> -> vector<256x64xf32>
    %c0_15 = arith.constant 0 : index
    %c0_16 = arith.constant 0 : index
    %19 = vector.load %arg7[%c0_15, %c0_16] : memref<1x64xf32, #tpu.memory_space<vmem>>, vector<1x64xf32>
    %20 = vector.broadcast %19 : vector<1x64xf32> to vector<256x64xf32>
    %21 = arith.addf %18, %20 : vector<256x64xf32>
    %cst_17 = arith.constant 0.000000e+00 : f32
    %22 = vector.broadcast %cst_17 : f32 to vector<256x64xf32>
    %23 = arith.maximumf %21, %22 : vector<256x64xf32>
    %24 = arith.truncf %23 : vector<256x64xf32> to vector<256x64xbf16>
    %c0_18 = arith.constant 0 : index
    %c0_19 = arith.constant 0 : index
    %25 = vector.load %arg8[%c0_18, %c0_19] : memref<64x32xbf16, #tpu.memory_space<vmem>>, vector<64x32xbf16>
    %cst_20 = arith.constant dense<0.000000e+00> : vector<256x32xf32>
    %26 = tpu.matmul %24, %25, %cst_20 {dimension_numbers = #tpu.dot_dimension_numbers<[1], [0], [0], [1], [0, 0, 1, 1], [], []>} : vector<256x64xbf16>, vector<64x32xbf16>, vector<256x32xf32> -> vector<256x32xf32>
    %c0_21 = arith.constant 0 : index
    %c0_22 = arith.constant 0 : index
    %27 = vector.load %arg9[%c0_21, %c0_22] : memref<1x32xf32, #tpu.memory_space<vmem>>, vector<1x32xf32>
    %28 = vector.broadcast %27 : vector<1x32xf32> to vector<256x32xf32>
    %29 = arith.addf %26, %28 : vector<256x32xf32>
    %cst_23 = arith.constant 0.000000e+00 : f32
    %30 = vector.broadcast %cst_23 : f32 to vector<256x32xf32>
    %31 = arith.maximumf %29, %30 : vector<256x32xf32>
    %32 = arith.truncf %31 : vector<256x32xf32> to vector<256x32xbf16>
    %c0_24 = arith.constant 0 : index
    %c0_25 = arith.constant 0 : index
    %33 = vector.load %arg10[%c0_24, %c0_25] : memref<32x8xbf16, #tpu.memory_space<vmem>>, vector<32x8xbf16>
    %cst_26 = arith.constant dense<0.000000e+00> : vector<256x8xf32>
    %34 = tpu.matmul %32, %33, %cst_26 {dimension_numbers = #tpu.dot_dimension_numbers<[1], [0], [0], [1], [0, 0, 1, 1], [], []>} : vector<256x32xbf16>, vector<32x8xbf16>, vector<256x8xf32> -> vector<256x8xf32>
    %c0_27 = arith.constant 0 : index
    %c0_28 = arith.constant 0 : index
    %35 = vector.load %arg11[%c0_27, %c0_28] : memref<1x8xf32, #tpu.memory_space<vmem>>, vector<1x8xf32>
    %36 = vector.broadcast %35 : vector<1x8xf32> to vector<256x8xf32>
    %37 = arith.addf %34, %36 : vector<256x8xf32>
    %cst_29 = arith.constant 0.000000e+00 : f32
    %38 = vector.broadcast %cst_29 : f32 to vector<256x8xf32>
    %39 = arith.maximumf %37, %38 : vector<256x8xf32>
    %40 = arith.truncf %39 : vector<256x8xf32> to vector<256x8xbf16>
    %c0_30 = arith.constant 0 : index
    %c0_31 = arith.constant 0 : index
    %41 = vector.load %arg12[%c0_30, %c0_31] : memref<8x8xbf16, #tpu.memory_space<vmem>>, vector<8x8xbf16>
    %cst_32 = arith.constant dense<0.000000e+00> : vector<256x8xf32>
    %42 = tpu.matmul %40, %41, %cst_32 {dimension_numbers = #tpu.dot_dimension_numbers<[1], [0], [0], [1], [0, 0, 1, 1], [], []>} : vector<256x8xbf16>, vector<8x8xbf16>, vector<256x8xf32> -> vector<256x8xf32>
    %c0_33 = arith.constant 0 : index
    %c0_34 = arith.constant 0 : index
    %43 = vector.load %arg13[%c0_33, %c0_34] : memref<1x8xf32, #tpu.memory_space<vmem>>, vector<1x8xf32>
    %44 = vector.broadcast %43 : vector<1x8xf32> to vector<256x8xf32>
    %45 = arith.addf %42, %44 : vector<256x8xf32>
    %46 = arith.negf %45 : vector<256x8xf32>
    %47 = math.exp %46 : vector<256x8xf32>
    %cst_35 = arith.constant 1.000000e+00 : f32
    %48 = vector.broadcast %cst_35 : f32 to vector<256x8xf32>
    %49 = arith.addf %48, %47 : vector<256x8xf32>
    %50 = arith.divf %48, %49 : vector<256x8xf32>
    %c0_36 = arith.constant 0 : index
    %c0_37 = arith.constant 0 : index
    %51 = vector.load %arg14[%c0_36, %c0_37] : memref<256x8xf32, #tpu.memory_space<vmem>>, vector<256x8xf32>
    tpu.vector_store %arg14[%c0_36, %c0_37], %50 {strides = array<i32>} : memref<256x8xf32, #tpu.memory_space<vmem>>, vector<256x8xf32>,
    return
  }
  func.func @transform_0(%arg0: i32) -> (i32, i32) {
    %c0_i32 = arith.constant 0 : i32
    %c0_i32_0 = arith.constant 0 : i32
    return %arg0, %c0_i32 : i32, i32
  }
  func.func @transform_1(%arg0: i32) -> (i32, i32) {
    %c0_i32 = arith.constant 0 : i32
    %c0_i32_0 = arith.constant 0 : i32
    %c0_i32_1 = arith.constant 0 : i32
    return %c0_i32, %c0_i32_0 : i32, i32
  }
  func.func @transform_2(%arg0: i32) -> (i32, i32) {
    %c0_i32 = arith.constant 0 : i32
    %c0_i32_0 = arith.constant 0 : i32
    %c0_i32_1 = arith.constant 0 : i32
    return %c0_i32, %c0_i32_0 : i32, i32
  }
  func.func @transform_3(%arg0: i32) -> (i32, i32) {
    %c0_i32 = arith.constant 0 : i32
    %c0_i32_0 = arith.constant 0 : i32
    %c0_i32_1 = arith.constant 0 : i32
    return %c0_i32, %c0_i32_0 : i32, i32
  }
  func.func @transform_4(%arg0: i32) -> (i32, i32) {
    %c0_i32 = arith.constant 0 : i32
    %c0_i32_0 = arith.constant 0 : i32
    %c0_i32_1 = arith.constant 0 : i32
    return %c0_i32, %c0_i32_0 : i32, i32
  }
  func.func @transform_5(%arg0: i32) -> (i32, i32) {
    %c0_i32 = arith.constant 0 : i32
    %c0_i32_0 = arith.constant 0 : i32
    %c0_i32_1 = arith.constant 0 : i32
    return %c0_i32, %c0_i32_0 : i32, i32
  }
  func.func @transform_6(%arg0: i32) -> (i32, i32) {
    %c0_i32 = arith.constant 0 : i32
    %c0_i32_0 = arith.constant 0 : i32
    %c0_i32_1 = arith.constant 0 : i32
    return %c0_i32, %c0_i32_0 : i32, i32
  }
  func.func @transform_7(%arg0: i32) -> (i32, i32) {
    %c0_i32 = arith.constant 0 : i32
    %c0_i32_0 = arith.constant 0 : i32
    %c0_i32_1 = arith.constant 0 : i32
    return %c0_i32, %c0_i32_0 : i32, i32
  }
  func.func @transform_8(%arg0: i32) -> (i32, i32) {
    %c0_i32 = arith.constant 0 : i32
    %c0_i32_0 = arith.constant 0 : i32
    %c0_i32_1 = arith.constant 0 : i32
    return %c0_i32, %c0_i32_0 : i32, i32
  }
  func.func @transform_9(%arg0: i32) -> (i32, i32) {
    %c0_i32 = arith.constant 0 : i32
    %c0_i32_0 = arith.constant 0 : i32
    %c0_i32_1 = arith.constant 0 : i32
    return %c0_i32, %c0_i32_0 : i32, i32
  }
  func.func @transform_10(%arg0: i32) -> (i32, i32) {
    %c0_i32 = arith.constant 0 : i32
    %c0_i32_0 = arith.constant 0 : i32
    %c0_i32_1 = arith.constant 0 : i32
    return %c0_i32, %c0_i32_0 : i32, i32
  }
  func.func @transform_11(%arg0: i32) -> (i32, i32) {
    %c0_i32 = arith.constant 0 : i32
    %c0_i32_0 = arith.constant 0 : i32
    %c0_i32_1 = arith.constant 0 : i32
    return %c0_i32, %c0_i32_0 : i32, i32
  }
  func.func @transform_12(%arg0: i32) -> (i32, i32) {
    %c0_i32 = arith.constant 0 : i32
    %c0_i32_0 = arith.constant 0 : i32
    %c0_i32_1 = arith.constant 0 : i32
    return %c0_i32, %c0_i32_0 : i32, i32
  }
  func.func @transform_13(%arg0: i32) -> (i32, i32) {
    %c0_i32 = arith.constant 0 : i32
    %c0_i32_0 = arith.constant 0 : i32
    return %arg0, %c0_i32 : i32, i32
  }
}

</mosaic_0001>

<bundles_post_ra>
// kernel: tpu_custom_call.1
= control target key start
LH: loop header
LB: loop body
LE: loop exit
PB: predicated region body
PF: predicated region fallthrough
CT: control target
= control target key end

     0   :  { %s3446_s25 = smov 0   ;;  %s4013_s0 = inlined_call_operand.vmem [shape: bf16[512,32], index: 0, kind: input, shape index: {}]   ;;  %s4014_s1 = inlined_call_operand.vmem [shape: bf16[32,128], index: 1, kind: input, shape index: {}]   ;;  %s4015_s2 = inlined_call_operand.vmem [shape: f32[1,128], index: 2, kind: input, shape index: {}]   ;;  %s4016_s3 = inlined_call_operand.vmem [shape: bf16[128,256], index: 3, kind: input, shape index: {}]   ;;  %s4017_s4 = inlined_call_operand.vmem [shape: f32[1,256], index: 4, kind: input, shape index: {}]   ;;  %s4018_s5 = inlined_call_operand.vmem [shape: bf16[256,64], index: 5, kind: input, shape index: {}]   ;;  %s4019_s6 = inlined_call_operand.vmem [shape: f32[1,64], index: 6, kind: input, shape index: {}]   ;;  %s4020_s7 = inlined_call_operand.vmem [shape: bf16[64,32], index: 7, kind: input, shape index: {}]   ;;  %s4021_s8 = inlined_call_operand.vmem [shape: f32[1,32], index: 8, kind: input, shape index: {}]   ;;  %s4022_s9 = inlined_call_operand.vmem [shape: bf16[32,8], index: 9, kind: input, shape index: {}]   ;;  %s4023_s10 = inlined_call_operand.vmem [shape: f32[1,8], index: 10, kind: input, shape index: {}]   ;;  %s4024_s11 = inlined_call_operand.vmem [shape: bf16[8,8], index: 11, kind: input, shape index: {}]   ;;  %s4025_s12 = inlined_call_operand.vmem [shape: f32[1,8], index: 12, kind: input, shape index: {}]   ;;  %s4026_s13 = inlined_call_operand.vmem [shape: f32[512,8], index: 13, kind: output, shape index: {}]  }
   0x1 LB: > { %s2658_s26 = sadd.s32 4294967295, %s3373_s25   ;;  %p2662_p0 = scmp.ge.s32.totalorder %s3373_s25, 1  ;;  %s3373_s25 = sphi %s3446_s25, %s23_s25  }
   0x2   : > { %p388_p1 = scmp.lt.s32.totalorder %s3373_s25, 3 }
   0x4   : > { %p389_p2 = pnand %p2662_p0, %p388_p1 }
   0x5   : > { %v3175_v0 = vld [vmem:[%s4014_s1] sm:$0xff] (!%p389_p2)   ;;  %s2663_s29 = sshll.u32 (!%p389_p2), %s2658_s26, 5  ;;  %v3176_v1 = vld [vmem:[%s4014_s1 + $0x8] sm:$0xff] (!%p389_p2)   ;;  %v3196_v4 = vld [vmem:[%s4016_s3 + $0x14] ss:$8 sps:$4 sm:$0xff] (!%p389_p2)   ;;  %vm580_vm0 = vcmask (!%p389_p2), 261120  }
   0x6   : > { %392 = sbr.rel (%p389_p2) target bundleno = 1494 (0x5d6), region = 72  ;;  %p433_p3 = scmp.lt.s32.totalorder (!%p389_p2), %s2663_s29, 63  ;;  %3011 = vmatprep.subr.bf16.mxu0 (!%p389_p2), %v3175_v0  ;;  %v3193_v2 = vld [vmem:[%s4016_s3 + $0x4] ss:$8 sps:$4 sm:$0xff] (!%p389_p2)   ;;  %v3195_v3 = vld [vmem:[%s4016_s3] ss:$8 sps:$4 sm:$0xff] (!%p389_p2)  }
   0x7   : > { %3012 = vmatpush3.bf16.msra.mxu0 (!%p389_p2), %v3175_v0  ;;  %946 = vmatprep.subr.bf16.mxu1 (!%p389_p2), %v3193_v2  ;;  %v3198_v5 = vld [vmem:[%s4016_s3 + $0x10] ss:$8 sps:$4 sm:$0xff] (!%p389_p2)   ;;  %v3199_v6 = vld [vmem:[%s4016_s3 + $0x24] ss:$8 sps:$4 sm:$0xff] (!%p389_p2)   ;;  %v3201_v8 = vld [vmem:[%s4016_s3 + $0x20] ss:$8 sps:$4 sm:$0xff] (!%p389_p2)  }
   0x8   : > { %3013 = vmatprep.subr.bf16.mxu0 (!%p389_p2), %v3176_v1  ;;  %947 = vmatpush1.bf16.msra.mxu1 (!%p389_p2), %v3195_v3  ;;  %v3202_v11 = vld [vmem:[%s4016_s3 + $0x34] ss:$8 sps:$4 sm:$0xff] (!%p389_p2)   ;;  %v3204_v16 = vld [vmem:[%s4016_s3 + $0x30] ss:$8 sps:$4 sm:$0xff] (!%p389_p2)   ;;  %v3205_v17 = vld [vmem:[%s4016_s3 + $0x44] ss:$8 sps:$4 sm:$0xff] (!%p389_p2)  }
   0x9   : > { %948 = vmatprep.subr.bf16.mxu1 (!%p389_p2), %v3196_v4  ;;  %v3207_v18 = vld [vmem:[%s4016_s3 + $0x40] ss:$8 sps:$4 sm:$0xff] (!%p389_p2)   ;;  %v3208_v19 = vld [vmem:[%s4016_s3 + $0x54] ss:$8 sps:$4 sm:$0xff] (!%p389_p2)   ;;  %v3210_v20 = vld [vmem:[%s4016_s3 + $0x50] ss:$8 sps:$4 sm:$0xff] (!%p389_p2)  }
   0xa   : > { %v3211_v30 = vld [vmem:[%s4016_s3 + $0x64] ss:$8 sps:$4 sm:$0xff] (!%p389_p2)   ;;  %v3213_v31 = vld [vmem:[%s4016_s3 + $0x60] ss:$8 sps:$4 sm:$0xff] (!%p389_p2)   ;;  %v3214_v32 = vld [vmem:[%s4016_s3 + $0x74] ss:$8 sps:$4 sm:$0xff] (!%p389_p2)  }
   0xb   : > { %3014 = vmatpush3.bf16.msra.mxu0 (!%p389_p2), %v3176_v1  ;;  %v3216_v33 = vld [vmem:[%s4016_s3 + $0x70] ss:$8 sps:$4 sm:$0xff] (!%p389_p2)   ;;  %v3375_v34 = vmov (!%p389_p2), 0   ;;  %v3552_v35 = vld [vmem:[%s4015_s2] ss:$0 sm:$0xff] (!%p389_p2)  ;;  %v3219_v43 = vld [vmem:[%s4018_s5 + $0x48] sm:$0xff] (!%p389_p2)  }
   0xc   : > { %949 = vmatpush1.bf16.msra.mxu1 (!%p389_p2), %v3198_v5  ;;  %978 = vmatprep.mubr.bf16.mxu1 (!%p389_p2), %v3375_v34  ;;  %v3217_v41 = vld [vmem:[%s4018_s5 + $0x40] sm:$0xff] (!%p389_p2)   ;;  %v3220_v49 = vld [vmem:[%s4018_s5 + $0x8] sm:$0xff] (!%p389_p2)   ;;  %v3221_v52 = vld [vmem:[%s4018_s5 + $0x50] sm:$0xff] (!%p389_p2)   ;;  %vm1618_vm1 = vcmask (!%p389_p2), 523264   ;;  %vm2213_vm2 = vcmask (!%p389_p2), 1043456   ;;  %vm2164_vm3 = vcmask (!%p389_p2), 64512  }
   0xd   : > { %s4028_s29 = smov (!%p433_p3, %s2663_s29), 63  ;;  %950 = vmatprep.subr.bf16.mxu1 %v3199_v6  ;;  %v3218_v42 = vld [vmem:[%s4018_s5] sm:$0xff]   ;;  %2844 = vmatprep.subr.bf16.mxu0 %v3217_v41  ;;  %v3222_v58 = vld [vmem:[%s4018_s5 + $0x10] sm:$0xff]   ;;  %v3223_v61 = vld [vmem:[%s4018_s5 + $0x58] sm:$0xff]  }
   0xe   : > { %s2664_s21 = sshll.u32 %s4028_s29, 2  ;;  %v3224_v4 = vld [vmem:[%s4018_s5 + $0x18] sm:$0xff]   ;;  %v3225_v6 = vld [vmem:[%s4018_s5 + $0x60] sm:$0xff]   ;;  %s2666_s20 = sshll.u32 %s4028_s29, 3 }
   0xf   : > { %s3478_s27 = scalar_lea.vmem %s4013_s0, %s2664_s21  ;;  %s3920_s22 = scalar_lea.vmem %s4026_s13, %s2666_s20 }
  0x10   : > { %v3177_v7 = vld [vmem:[%s3478_s27] sm:$0xff]   ;;  %v3178_v9 = vld [vmem:[%s3478_s27 + $0x8] sm:$0xff]   ;;  %v3179_v10 = vld [vmem:[%s3478_s27 + $0x10] sm:$0xff]   ;;  %951 = vmatpush1.bf16.msra.mxu1 %v3201_v8 }
  0x11   : > { %3015 = vmatprep.mubr.msk.bf16.mxu0 %vm580_vm0, %v3177_v7  ;;  %v3180_v12 = vld [vmem:[%s3478_s27 + $0x18] sm:$0xff]   ;;  %952 = vmatprep.subr.bf16.mxu1 %v3202_v11  ;;  %v3181_v13 = vld [vmem:[%s3478_s27 + $0x20] sm:$0xff]   ;;  %v3182_v14 = vld [vmem:[%s3478_s27 + $0x28] sm:$0xff]  }
  0x12   : > { %3016 = vmatmul.mubr.msk.bf16.vlgmr.msra.gmra.mrb[0].mxu0 %vm580_vm0, %v3178_v9  ;;  %v3183_v15 = vld [vmem:[%s3478_s27 + $0x30] sm:$0xff]   ;;  %v3184_v21 = vld [vmem:[%s3478_s27 + $0x38] sm:$0xff]   ;;  %v3185_v22 = vld [vmem:[%s3478_s27 + $0x40] sm:$0xff]  }
  0x13   : > { %3019 = vmatprep.mubr.msk.bf16.mxu0 %vm580_vm0, %v3179_v10  ;;  %v3186_v23 = vld [vmem:[%s3478_s27 + $0x48] sm:$0xff]   ;;  %v3187_v24 = vld [vmem:[%s3478_s27 + $0x50] sm:$0xff]   ;;  %v3188_v25 = vld [vmem:[%s3478_s27 + $0x58] sm:$0xff]   ;;  %2845 = vmatpush3.bf16.msra.mxu0 %v3218_v42 }
  0x14   : > { %953 = vmatpush1.bf16.msra.mxu1 %v3204_v16  ;;  %v3189_v26 = vld [vmem:[%s3478_s27 + $0x60] sm:$0xff]   ;;  %v3190_v27 = vld [vmem:[%s3478_s27 + $0x68] sm:$0xff]   ;;  %v3191_v28 = vld [vmem:[%s3478_s27 + $0x70] sm:$0xff]   ;;  %2846 = vmatprep.subr.bf16.mxu0 %v3219_v43 }
  0x15   : > { %954 = vmatprep.subr.bf16.mxu1 %v3205_v17  ;;  %v3192_v29 = vld [vmem:[%s3478_s27 + $0x78] sm:$0xff]  }
  0x17   : > { %2847 = vmatpush3.bf16.msra.mxu0 %v3220_v49 }
  0x18   : > { %955 = vmatpush1.bf16.msra.mxu1 %v3207_v18  ;;  %2848 = vmatprep.subr.bf16.mxu0 %v3221_v52 }
  0x19   : > { %956 = vmatprep.subr.bf16.mxu1 %v3208_v19 }
  0x1a   : > { %3020 = vmatmul.mubr.msk.bf16.gmra.mrb[4].mxu0 %vm580_vm0, %v3180_v12  ;;  %v3226_v12 = vld [vmem:[%s4018_s5 + $0x20] sm:$0xff]  }
  0x1b   : > { %3023 = vmatprep.mubr.msk.bf16.mxu0 %vm580_vm0, %v3181_v13  ;;  %2849 = vmatpush3.bf16.msra.mxu0 %v3222_v58 }
  0x1c   : > { %957 = vmatpush1.bf16.msra.mxu1 %v3210_v20  ;;  %2850 = vmatprep.subr.bf16.mxu0 %v3223_v61 }
  0x1d   : > { %958 = vmatprep.subr.bf16.mxu1 %v3211_v30  ;;  %v3230_v30 = vld [vmem:[%s4018_s5 + $0x30] sm:$0xff]  }
  0x1f   : > { %2851 = vmatpush3.bf16.msra.mxu0 %v3224_v4 }
  0x20   : > { %959 = vmatpush1.bf16.msra.mxu1 %v3213_v31  ;;  %2852 = vmatprep.subr.bf16.mxu0 %v3225_v6 }
  0x21   : > { %960 = vmatprep.subr.bf16.mxu1 %v3214_v32 }
  0x22   : > { %3024 = vmatmul.mubr.msk.bf16.gmra.mrb[8].mxu0 %vm580_vm0, %v3182_v14 }
  0x23   : > { %3027 = vmatprep.mubr.msk.bf16.mxu0 %vm580_vm0, %v3183_v15  ;;  %v3227_v15 = vld [vmem:[%s4018_s5 + $0x68] sm:$0xff]   ;;  %2853 = vmatpush3.bf16.msra.mxu0 %v3226_v12 }
  0x24   : > { %961 = vmatpush1.bf16.msra.mxu1 %v3216_v33  ;;  %2854 = vmatprep.subr.bf16.mxu0 %v3227_v15 }
  0x2a   : > { %3028 = vmatmul.mubr.msk.bf16.gmra.mrb[12].mxu0 %vm580_vm0, %v3184_v21 }
  0x2b   : > { %3031 = vmatprep.mubr.msk.bf16.mxu0 %vm580_vm0, %v3185_v22  ;;  %v3228_v22 = vld [vmem:[%s4018_s5 + $0x28] sm:$0xff]  }
  0x2c   : > { %2855 = vmatpush3.bf16.msra.mxu0 %v3228_v22 }
  0x32   : > { %3032 = vmatmul.mubr.msk.bf16.gmra.mrb[16].mxu0 %vm580_vm0, %v3186_v23 }
  0x33   : > { %3035 = vmatprep.mubr.msk.bf16.mxu0 %vm580_vm0, %v3187_v24  ;;  %v3229_v24 = vld [vmem:[%s4018_s5 + $0x70] sm:$0xff]  }
  0x34   : > { %2856 = vmatprep.subr.bf16.mxu0 %v3229_v24 }
  0x35   : > { %2857 = vmatpush3.bf16.msra.mxu0 %v3230_v30 }
  0x3a   : > { %3036 = vmatmul.mubr.msk.bf16.gmra.mrb[20].mxu0 %vm580_vm0, %v3188_v25 }
  0x3b   : > { %3039 = vmatprep.mubr.msk.bf16.mxu0 %vm580_vm0, %v3189_v26 }
  0x42   : > { %3040 = vmatmul.mubr.msk.bf16.gmra.mrb[24].mxu0 %vm580_vm0, %v3190_v27 }
  0x43   : > { %3043 = vmatprep.mubr.msk.bf16.mxu0 %vm580_vm0, %v3191_v28 }
  0x4a   : > { %3044 = vmatmul.mubr.msk.bf16.gmra.mrb[28].mxu0 %vm580_vm0, %v3192_v29 }
  0xe5   : > { %v3017_v36 = vpop.f32.mrb[0].mxu0 }
  0xe6   : > { %v672_v37 = vadd.f32 %v3017_v36, %v3552_v35  ;;  %v663_v38 = vpop.f32.mrb[1].mxu0 }
  0xe7   : > { %v664_v39 = vadd.f32 %v3552_v35, %v663_v38  ;;  %v3018_v40 = vpop.f32.mrb[2].mxu0 }
  0xe8   : > { %v675_v44 = vadd.f32 %v3018_v40, %v3552_v35  ;;  %v666_v45 = vpop.f32.mrb[3].mxu0  ;;  %v792_v47 = vmax.f32 %v672_v37, 0.0 }
  0xe9   : > { %v667_v46 = vadd.f32 %v3552_v35, %v666_v45  ;;  %v790_v50 = vmax.f32 %v664_v39, 0.0 }
  0xea   : > { %v793_v48 = vmax.f32 %v675_v44, 0.0 }
  0xeb   : > { %v791_v51 = vmax.f32 %v667_v46, 0.0 }
  0xec   : > { %v823_v53 = vpack.c.bf16 %v793_v48, %v792_v47 }
  0xed   : > { %v822_v54 = vpack.c.bf16 %v791_v51, %v790_v50  ;;  %v3021_v55 = vpop.f32.mrb[4].mxu0 }
  0xee   : > { %v688_v56 = vadd.f32 %v3021_v55, %v3552_v35  ;;  %v679_v57 = vpop.f32.mrb[5].mxu0 }
  0xef   : > { %979 = vmatmul.mubr.bf16.vlgmr.msra.gmra.mrb[0].mxu1 %v822_v54  ;;  %v680_v59 = vadd.f32 %v3552_v35, %v679_v57  ;;  %v3022_v60 = vpop.f32.mrb[6].mxu0 }
  0xf0   : > { %v796_v62 = vmax.f32 %v688_v56, 0.0  ;;  %v691_v63 = vadd.f32 %v3022_v60, %v3552_v35  ;;  %v682_v0 = vpop.f32.mrb[7].mxu0  ;;  %988 = vmatprep.mubr.bf16.mxu1 %v3375_v34 }
  0xf1   : > { %v794_v1 = vmax.f32 %v680_v59, 0.0  ;;  %v683_v2 = vadd.f32 %v3552_v35, %v682_v0 }
  0xf2   : > { %v797_v3 = vmax.f32 %v691_v63, 0.0 }
  0xf3   : > { %v795_v5 = vmax.f32 %v683_v2, 0.0 }
  0xf4   : > { %v825_v7 = vpack.c.bf16 %v797_v3, %v796_v62 }
  0xf5   : > { %v824_v8 = vpack.c.bf16 %v795_v5, %v794_v1  ;;  %v3025_v9 = vpop.f32.mrb[8].mxu0 }
  0xf6   : > { %v704_v10 = vadd.f32 %v3025_v9, %v3552_v35  ;;  %v695_v11 = vpop.f32.mrb[9].mxu0 }
  0xf7   : > { %989 = vmatmul.mubr.bf16.gmra.mrb[4].mxu1 %v823_v53  ;;  %v696_v13 = vadd.f32 %v3552_v35, %v695_v11  ;;  %v3026_v14 = vpop.f32.mrb[10].mxu0 }
  0xf8   : > { %998 = vmatprep.mubr.bf16.mxu1 %v3375_v34  ;;  %v800_v16 = vmax.f32 %v704_v10, 0.0  ;;  %v707_v17 = vadd.f32 %v3026_v14, %v3552_v35  ;;  %v698_v18 = vpop.f32.mrb[11].mxu0 }
  0xf9   : > { %v798_v19 = vmax.f32 %v696_v13, 0.0  ;;  %v699_v20 = vadd.f32 %v3552_v35, %v698_v18 }
  0xfa   : > { %v801_v21 = vmax.f32 %v707_v17, 0.0 }
  0xfb   : > { %v799_v23 = vmax.f32 %v699_v20, 0.0 }
  0xfc   : > { %v827_v25 = vpack.c.bf16 %v801_v21, %v800_v16 }
  0xfd   : > { %v826_v26 = vpack.c.bf16 %v799_v23, %v798_v19  ;;  %v3029_v27 = vpop.f32.mrb[12].mxu0 }
  0xfe   : > { %v720_v28 = vadd.f32 %v3029_v27, %v3552_v35  ;;  %v711_v29 = vpop.f32.mrb[13].mxu0 }
  0xff   : > { %999 = vmatmul.mubr.bf16.gmra.mrb[8].mxu1 %v824_v8  ;;  %v712_v31 = vadd.f32 %v3552_v35, %v711_v29  ;;  %v3030_v32 = vpop.f32.mrb[14].mxu0 }
 0x100   : > { %1008 = vmatprep.mubr.bf16.mxu1 %v3375_v34  ;;  %v804_v33 = vmax.f32 %v720_v28, 0.0  ;;  %v723_v36 = vadd.f32 %v3030_v32, %v3552_v35  ;;  %v714_v37 = vpop.f32.mrb[15].mxu0 }
 0x101   : > { %v802_v38 = vmax.f32 %v712_v31, 0.0  ;;  %v715_v39 = vadd.f32 %v3552_v35, %v714_v37 }
 0x102   : > { %v805_v40 = vmax.f32 %v723_v36, 0.0 }
 0x103   : > { %v803_v41 = vmax.f32 %v715_v39, 0.0  ;;  %v856_v39 = vlaneseq }
 0x104   : > { %v3615_v42 = vpack.c.bf16 %v805_v40, %v804_v33 }
 0x105   : > { %v828_v43 = vpack.c.bf16 %v803_v41, %v802_v38  ;;  %v3033_v44 = vpop.f32.mrb[16].mxu0  ;;  %v3232_v38 = vld [vmem:[%s4018_s5 + $0x38] sm:$0xff]   ;;  %v857_v40 = vshrl.u32 %v856_v39, 7 }
 0x106   : > { %v736_v45 = vadd.f32 %v3033_v44, %v3552_v35  ;;  %v727_v46 = vpop.f32.mrb[17].mxu0 }
 0x107   : > { %1009 = vmatmul.mubr.bf16.gmra.mrb[12].mxu1 %v825_v7  ;;  %v728_v47 = vadd.f32 %v3552_v35, %v727_v46  ;;  %v3034_v48 = vpop.f32.mrb[18].mxu0  ;;  %v858_v41 = vsub.s32 0, %v857_v40 }
 0x108   : > { %1018 = vmatprep.mubr.bf16.mxu1 %v3375_v34  ;;  %v808_v49 = vmax.f32 %v736_v45, 0.0  ;;  %v739_v50 = vadd.f32 %v3034_v48, %v3552_v35  ;;  %v730_v51 = vpop.f32.mrb[19].mxu0 }
 0x109   : > { %v806_v52 = vmax.f32 %v728_v47, 0.0  ;;  %v731_v53 = vadd.f32 %v3552_v35, %v730_v51 }
 0x10a   : > { %v809_v54 = vmax.f32 %v739_v50, 0.0 }
 0x10b   : > { %v807_v55 = vmax.f32 %v731_v53, 0.0 }
 0x10c   : > { %v831_v56 = vpack.c.bf16 %v809_v54, %v808_v49 }
 0x10d   : > { %v830_v57 = vpack.c.bf16 %v807_v55, %v806_v52  ;;  %v3037_v58 = vpop.f32.mrb[20].mxu0  ;;  %v3233_v52 = vld [vmem:[%s4020_s7] sm:$0xff]  }
 0x10e   : > { %v752_v59 = vadd.f32 %v3037_v58, %v3552_v35  ;;  %v743_v60 = vpop.f32.mrb[21].mxu0  ;;  %3157 = vmatprep.subr.bf16.mxu1 %v3233_v52 }
 0x10f   : > { %1019 = vmatmul.mubr.bf16.gmra.mrb[16].mxu1 %v826_v26  ;;  %v744_v61 = vadd.f32 %v3552_v35, %v743_v60  ;;  %v3038_v62 = vpop.f32.mrb[22].mxu0 }
 0x110   : > { %1028 = vmatprep.mubr.bf16.mxu1 %v3375_v34  ;;  %v812_v63 = vmax.f32 %v752_v59, 0.0  ;;  %v755_v0 = vadd.f32 %v3038_v62, %v3552_v35  ;;  %v746_v1 = vpop.f32.mrb[23].mxu0  ;;  %3161 = vmatpush3.bf16.msra.mxu1 %v3233_v52 }
 0x111   : > { %v810_v2 = vmax.f32 %v744_v61, 0.0  ;;  %v747_v3 = vadd.f32 %v3552_v35, %v746_v1 }
 0x112   : > { %v813_v4 = vmax.f32 %v755_v0, 0.0 }
 0x113   : > { %v811_v5 = vmax.f32 %v747_v3, 0.0 }
 0x114   : > { %v833_v6 = vpack.c.bf16 %v813_v4, %v812_v63 }
 0x115   : > { %v832_v7 = vpack.c.bf16 %v811_v5, %v810_v2  ;;  %v3041_v8 = vpop.f32.mrb[24].mxu0 }
 0x116   : > { %v768_v9 = vadd.f32 %v3041_v8, %v3552_v35  ;;  %v759_v10 = vpop.f32.mrb[25].mxu0 }
 0x117   : > { %1029 = vmatmul.mubr.bf16.gmra.mrb[20].mxu1 %v827_v25  ;;  %v760_v11 = vadd.f32 %v3552_v35, %v759_v10  ;;  %v3042_v12 = vpop.f32.mrb[26].mxu0 }
 0x118   : > { %1038 = vmatprep.mubr.bf16.mxu1 %v3375_v34  ;;  %v816_v13 = vmax.f32 %v768_v9, 0.0  ;;  %v771_v14 = vadd.f32 %v3042_v12, %v3552_v35  ;;  %v762_v15 = vpop.f32.mrb[27].mxu0 }
 0x119   : > { %v814_v16 = vmax.f32 %v760_v11, 0.0  ;;  %v763_v17 = vadd.f32 %v3552_v35, %v762_v15 }
 0x11a   : > { %v817_v18 = vmax.f32 %v771_v14, 0.0 }
 0x11b   : > { %v815_v19 = vmax.f32 %v763_v17, 0.0 }
 0x11c   : > { %v835_v20 = vpack.c.bf16 %v817_v18, %v816_v13 }
 0x11d   : > { %v834_v21 = vpack.c.bf16 %v815_v19, %v814_v16  ;;  %v3045_v22 = vpop.f32.mrb[28].mxu0 }
 0x11e   : > { %v784_v23 = vadd.f32 %v3045_v22, %v3552_v35  ;;  %v775_v24 = vpop.f32.mrb[29].mxu0 }
 0x11f   : > { %1039 = vmatmul.mubr.bf16.gmra.mrb[24].mxu1 %v828_v43  ;;  %v776_v25 = vadd.f32 %v3552_v35, %v775_v24  ;;  %v3046_v26 = vpop.f32.mrb[30].mxu0  ;;  %v862_v43 = vsub.s32 1, %v857_v40 }
 0x120   : > { %1048 = vmatprep.mubr.bf16.mxu1 %v3375_v34  ;;  %v820_v27 = vmax.f32 %v784_v23, 0.0  ;;  %v787_v28 = vadd.f32 %v3046_v26, %v3552_v35  ;;  %v778_v29 = vpop.f32.mrb[31].mxu0 }
 0x121   : > { %v818_v30 = vmax.f32 %v776_v25, 0.0  ;;  %v779_v31 = vadd.f32 %v3552_v35, %v778_v29  ;;  %v3231_v35 = vld [vmem:[%s4018_s5 + $0x78] sm:$0xff]  }
 0x122   : > { %v821_v32 = vmax.f32 %v787_v28, 0.0  ;;  %2858 = vmatprep.subr.bf16.mxu0 %v3231_v35 }
 0x123   : > { %v819_v33 = vmax.f32 %v779_v31, 0.0  ;;  %2859 = vmatpush3.bf16.msra.mxu0 %v3232_v38 }
 0x124   : > { %v837_v36 = vpack.c.bf16 %v821_v32, %v820_v27  ;;  %3047 = vmatprep.subr.bf16.mxu0 %v3233_v52 }
 0x125   : > { %v836_v37 = vpack.c.bf16 %v819_v33, %v818_v30 }
 0x127   : > { %1049 = vmatmul.mubr.bf16.gmra.mrb[28].mxu1 %v3615_v42  ;;  %v854_v42 = vld [vmem:[%s4017_s4] sm:$0x3] }
 0x128   : > { %1058 = vmatprep.mubr.bf16.mxu1 %v3375_v34  ;;  %v3655_v44 = vrot.slane %v854_v42, %v858_v41  ;;  %v3657_v45 = vrot.slane %v854_v42, %v862_v43 }
 0x12f   : > { %1059 = vmatmul.mubr.bf16.gmra.mrb[32].mxu1 %v830_v57 }
 0x130   : > { %1068 = vmatprep.mubr.bf16.mxu1 %v3375_v34 }
 0x137   : > { %1069 = vmatmul.mubr.bf16.gmra.mrb[36].mxu1 %v831_v56  ;;  %v3234_v56 = vld [vmem:[%s4020_s7 + $0x8] sm:$0xff]  }
 0x138   : > { %1078 = vmatprep.mubr.bf16.mxu1 %v3375_v34  ;;  %3158 = vmatprep.subr.bf16.mxu1 %v3234_v56 }
 0x139   : > { %3162 = vmatpush3.bf16.msra.mxu1 %v3234_v56 }
 0x13f   : > { %1079 = vmatmul.mubr.bf16.gmra.mrb[40].mxu1 %v832_v7 }
 0x140   : > { %1088 = vmatprep.mubr.bf16.mxu1 %v3375_v34 }
 0x147   : > { %1089 = vmatmul.mubr.bf16.gmra.mrb[44].mxu1 %v833_v6 }
 0x148   : > { %1098 = vmatprep.mubr.bf16.mxu1 %v3375_v34 }
 0x14f   : > { %1099 = vmatmul.mubr.bf16.gmra.mrb[48].mxu1 %v834_v21 }
 0x150   : > { %1108 = vmatprep.mubr.bf16.mxu1 %v3375_v34 }
 0x157   : > { %1109 = vmatmul.mubr.bf16.gmra.mrb[52].mxu1 %v835_v20 }
 0x158   : > { %1118 = vmatprep.mubr.bf16.mxu1 %v3375_v34 }
 0x15f   : > { %1119 = vmatmul.mubr.bf16.gmra.mrb[56].mxu1 %v836_v37 }
 0x160   : > { %1128 = vmatprep.mubr.bf16.mxu1 %v3375_v34 }
 0x167   : > { %1129 = vmatmul.mubr.bf16.gmra.mrb[60].mxu1 %v837_v36 }
 0x1c2   : > { %v980_v46 = vpop.f32.mrb[0].mxu1 }
 0x1c3   : > { %v981_v47 = vadd.f32 %v980_v46, %v3655_v44  ;;  %v982_v48 = vpop.f32.mrb[1].mxu1 }
 0x1c4   : > { %v983_v49 = vadd.f32 %v982_v48, %v3657_v45  ;;  %v984_v34 = vpop.f32.mrb[2].mxu1 }
 0x1c5   : > { %v985_v50 = vadd.f32 %v984_v34, %v3655_v44  ;;  %v986_v51 = vpop.f32.mrb[3].mxu1  ;;  %v1139_v54 = vmax.f32 %v981_v47, 0.0 }
 0x1c6   : > { %v987_v53 = vadd.f32 %v986_v51, %v3657_v45  ;;  %v1140_v57 = vmax.f32 %v983_v49, 0.0 }
 0x1c7   : > { %v1141_v55 = vmax.f32 %v985_v50, 0.0 }
 0x1c8   : > { %v1142_v58 = vmax.f32 %v987_v53, 0.0 }
 0x1c9   : > { %v1203_v59 = vpack.c.bf16 %v1141_v55, %v1139_v54 }
 0x1ca   : > { %v1204_v60 = vpack.c.bf16 %v1142_v58, %v1140_v57  ;;  %v990_v61 = vpop.f32.mrb[4].mxu1 }
 0x1cb   : > { %v991_v62 = vadd.f32 %v990_v61, %v3655_v44  ;;  %v992_v63 = vpop.f32.mrb[5].mxu1 }
 0x1cc   : > { %v993_v0 = vadd.f32 %v992_v63, %v3657_v45  ;;  %v994_v1 = vpop.f32.mrb[6].mxu1  ;;  %1402 = vmatprep.mubr.bf16.mxu0 %v1204_v60 }
 0x1cd   : > { %v995_v2 = vadd.f32 %v994_v1, %v3655_v44  ;;  %v996_v3 = vpop.f32.mrb[7].mxu1  ;;  %1403 = vmatmul.mubr.bf16.vlgmr.msra.gmra.mrb[32].mxu0 %v1203_v59  ;;  %v1143_v5 = vmax.f32 %v991_v62, 0.0 }
 0x1ce   : > { %v997_v4 = vadd.f32 %v996_v3, %v3657_v45  ;;  %3048 = vmatpush3.bf16.msra.mxu0 %v3233_v52  ;;  %v1144_v7 = vmax.f32 %v993_v0, 0.0 }
 0x1cf   : > { %v1145_v6 = vmax.f32 %v995_v2, 0.0  ;;  %3049 = vmatprep.subr.bf16.mxu0 %v3234_v56 }
 0x1d0   : > { %v1146_v8 = vmax.f32 %v997_v4, 0.0 }
 0x1d1   : > { %v1205_v9 = vpack.c.bf16 %v1145_v6, %v1143_v5 }
 0x1d2   : > { %v1206_v10 = vpack.c.bf16 %v1146_v8, %v1144_v7  ;;  %v1000_v11 = vpop.f32.mrb[8].mxu1  ;;  %3050 = vmatpush3.bf16.msra.mxu0 %v3234_v56 }
 0x1d3   : > { %v1001_v12 = vadd.f32 %v1000_v11, %v3655_v44  ;;  %v1002_v13 = vpop.f32.mrb[9].mxu1 }
 0x1d4   : > { %v1003_v14 = vadd.f32 %v1002_v13, %v3657_v45  ;;  %v1004_v15 = vpop.f32.mrb[10].mxu1  ;;  %1410 = vmatprep.mubr.bf16.mxu0 %v1206_v10 }
 0x1d5   : > { %v1005_v16 = vadd.f32 %v1004_v15, %v3655_v44  ;;  %v1006_v17 = vpop.f32.mrb[11].mxu1  ;;  %1411 = vmatmul.mubr.bf16.gmra.mrb[36].mxu0 %v1205_v9  ;;  %v1147_v19 = vmax.f32 %v1001_v12, 0.0 }
 0x1d6   : > { %v1007_v18 = vadd.f32 %v1006_v17, %v3657_v45  ;;  %v1148_v21 = vmax.f32 %v1003_v14, 0.0 }
 0x1d7   : > { %v1149_v20 = vmax.f32 %v1005_v16, 0.0 }
 0x1d8   : > { %v1150_v22 = vmax.f32 %v1007_v18, 0.0 }
 0x1d9   : > { %v1207_v23 = vpack.c.bf16 %v1149_v20, %v1147_v19 }
 0x1da   : > { %v1208_v24 = vpack.c.bf16 %v1150_v22, %v1148_v21  ;;  %v1010_v25 = vpop.f32.mrb[12].mxu1 }
 0x1db   : > { %v1011_v26 = vadd.f32 %v1010_v25, %v3655_v44  ;;  %v1012_v27 = vpop.f32.mrb[13].mxu1 }
 0x1dc   : > { %v1013_v28 = vadd.f32 %v1012_v27, %v3657_v45  ;;  %v1014_v29 = vpop.f32.mrb[14].mxu1  ;;  %1418 = vmatprep.mubr.bf16.mxu0 %v1208_v24 }
 0x1dd   : > { %v1015_v30 = vadd.f32 %v1014_v29, %v3655_v44  ;;  %v1016_v31 = vpop.f32.mrb[15].mxu1  ;;  %1419 = vmatmul.mubr.bf16.gmra.mrb[40].mxu0 %v1207_v23  ;;  %v1151_v33 = vmax.f32 %v1011_v26, 0.0 }
 0x1de   : > { %v1017_v32 = vadd.f32 %v1016_v31, %v3657_v45  ;;  %v1152_v37 = vmax.f32 %v1013_v28, 0.0 }
 0x1df   : > { %v1153_v36 = vmax.f32 %v1015_v30, 0.0 }
 0x1e0   : > { %v1154_v35 = vmax.f32 %v1017_v32, 0.0 }
 0x1e1   : > { %v1209_v38 = vpack.c.bf16 %v1153_v36, %v1151_v33 }
 0x1e2   : > { %v1210_v39 = vpack.c.bf16 %v1154_v35, %v1152_v37  ;;  %v1020_v40 = vpop.f32.mrb[16].mxu1 }
 0x1e3   : > { %v1021_v41 = vadd.f32 %v1020_v40, %v3655_v44  ;;  %v1022_v42 = vpop.f32.mrb[17].mxu1 }
 0x1e4   : > { %v1023_v43 = vadd.f32 %v1022_v42, %v3657_v45  ;;  %v1024_v46 = vpop.f32.mrb[18].mxu1  ;;  %1426 = vmatprep.mubr.bf16.mxu0 %v1210_v39 }
 0x1e5   : > { %v1025_v47 = vadd.f32 %v1024_v46, %v3655_v44  ;;  %v1026_v48 = vpop.f32.mrb[19].mxu1  ;;  %1427 = vmatmul.mubr.bf16.gmra.mrb[44].mxu0 %v1209_v38  ;;  %v1155_v34 = vmax.f32 %v1021_v41, 0.0 }
 0x1e6   : > { %v1027_v49 = vadd.f32 %v1026_v48, %v3657_v45  ;;  %v1156_v51 = vmax.f32 %v1023_v43, 0.0 }
 0x1e7   : > { %v1157_v50 = vmax.f32 %v1025_v47, 0.0 }
 0x1e8   : > { %v1158_v52 = vmax.f32 %v1027_v49, 0.0 }
 0x1e9   : > { %v1211_v53 = vpack.c.bf16 %v1157_v50, %v1155_v34 }
 0x1ea   : > { %v1212_v54 = vpack.c.bf16 %v1158_v52, %v1156_v51  ;;  %v1030_v55 = vpop.f32.mrb[20].mxu1 }
 0x1eb   : > { %v1031_v56 = vadd.f32 %v1030_v55, %v3655_v44  ;;  %v1032_v57 = vpop.f32.mrb[21].mxu1 }
 0x1ec   : > { %v1033_v58 = vadd.f32 %v1032_v57, %v3657_v45  ;;  %v1034_v59 = vpop.f32.mrb[22].mxu1  ;;  %1434 = vmatprep.mubr.bf16.mxu0 %v1212_v54 }
 0x1ed   : > { %v1035_v60 = vadd.f32 %v1034_v59, %v3655_v44  ;;  %v1036_v61 = vpop.f32.mrb[23].mxu1  ;;  %1435 = vmatmul.mubr.bf16.gmra.mrb[48].mxu0 %v1211_v53  ;;  %v1159_v63 = vmax.f32 %v1031_v56, 0.0 }
 0x1ee   : > { %v1037_v62 = vadd.f32 %v1036_v61, %v3657_v45  ;;  %v1160_v1 = vmax.f32 %v1033_v58, 0.0 }
 0x1ef   : > { %v1161_v0 = vmax.f32 %v1035_v60, 0.0 }
 0x1f0   : > { %v1162_v2 = vmax.f32 %v1037_v62, 0.0 }
 0x1f1   : > { %v1213_v3 = vpack.c.bf16 %v1161_v0, %v1159_v63 }
 0x1f2   : > { %v1214_v4 = vpack.c.bf16 %v1162_v2, %v1160_v1  ;;  %v1040_v5 = vpop.f32.mrb[24].mxu1 }
 0x1f3   : > { %v1041_v6 = vadd.f32 %v1040_v5, %v3655_v44  ;;  %v1042_v7 = vpop.f32.mrb[25].mxu1 }
 0x1f4   : > { %v1043_v8 = vadd.f32 %v1042_v7, %v3657_v45  ;;  %v1044_v9 = vpop.f32.mrb[26].mxu1  ;;  %1442 = vmatprep.mubr.bf16.mxu0 %v1214_v4 }
 0x1f5   : > { %v1045_v10 = vadd.f32 %v1044_v9, %v3655_v44  ;;  %v1046_v11 = vpop.f32.mrb[27].mxu1  ;;  %1443 = vmatmul.mubr.bf16.gmra.mrb[52].mxu0 %v1213_v3  ;;  %v1163_v13 = vmax.f32 %v1041_v6, 0.0 }
 0x1f6   : > { %v1047_v12 = vadd.f32 %v1046_v11, %v3657_v45  ;;  %v1164_v15 = vmax.f32 %v1043_v8, 0.0 }
 0x1f7   : > { %v1165_v14 = vmax.f32 %v1045_v10, 0.0 }
 0x1f8   : > { %v1166_v16 = vmax.f32 %v1047_v12, 0.0 }
 0x1f9   : > { %v1215_v17 = vpack.c.bf16 %v1165_v14, %v1163_v13 }
 0x1fa   : > { %v1216_v18 = vpack.c.bf16 %v1166_v16, %v1164_v15  ;;  %v1050_v19 = vpop.f32.mrb[28].mxu1 }
 0x1fb   : > { %v1051_v20 = vadd.f32 %v1050_v19, %v3655_v44  ;;  %v1052_v21 = vpop.f32.mrb[29].mxu1 }
 0x1fc   : > { %v1053_v22 = vadd.f32 %v1052_v21, %v3657_v45  ;;  %v1054_v23 = vpop.f32.mrb[30].mxu1  ;;  %1450 = vmatprep.mubr.bf16.mxu0 %v1216_v18 }
 0x1fd   : > { %v1055_v24 = vadd.f32 %v1054_v23, %v3655_v44  ;;  %v1056_v25 = vpop.f32.mrb[31].mxu1  ;;  %1451 = vmatmul.mubr.bf16.gmra.mrb[56].mxu0 %v1215_v17  ;;  %v1167_v27 = vmax.f32 %v1051_v20, 0.0 }
 0x1fe   : > { %v1057_v26 = vadd.f32 %v1056_v25, %v3657_v45  ;;  %v1168_v29 = vmax.f32 %v1053_v22, 0.0 }
 0x1ff   : > { %v1169_v28 = vmax.f32 %v1055_v24, 0.0 }
 0x200   : > { %v1170_v30 = vmax.f32 %v1057_v26, 0.0 }
 0x201   : > { %v1217_v31 = vpack.c.bf16 %v1169_v28, %v1167_v27 }
 0x202   : > { %v1218_v32 = vpack.c.bf16 %v1170_v30, %v1168_v29  ;;  %v1060_v33 = vpop.f32.mrb[32].mxu1 }
 0x203   : > { %v1061_v36 = vadd.f32 %v1060_v33, %v3655_v44  ;;  %v1062_v37 = vpop.f32.mrb[33].mxu1 }
 0x204   : > { %v1063_v35 = vadd.f32 %v1062_v37, %v3657_v45  ;;  %v1064_v38 = vpop.f32.mrb[34].mxu1  ;;  %1458 = vmatprep.mubr.bf16.mxu0 %v1218_v32 }
 0x205   : > { %v1065_v39 = vadd.f32 %v1064_v38, %v3655_v44  ;;  %v1066_v40 = vpop.f32.mrb[35].mxu1  ;;  %1459 = vmatmul.mubr.bf16.gmra.mrb[60].mxu0 %v1217_v31  ;;  %v1171_v42 = vmax.f32 %v1061_v36, 0.0 }
 0x206   : > { %v1067_v41 = vadd.f32 %v1066_v40, %v3657_v45  ;;  %v1172_v46 = vmax.f32 %v1063_v35, 0.0 }
 0x207   : > { %v1173_v43 = vmax.f32 %v1065_v39, 0.0 }
 0x208   : > { %v1174_v47 = vmax.f32 %v1067_v41, 0.0 }
 0x209   : > { %v1219_v48 = vpack.c.bf16 %v1173_v43, %v1171_v42  ;;  %v3235_v43 = vld [vmem:[%s4020_s7 + $0x10] sm:$0xff]  }
 0x20a   : > { %v1220_v49 = vpack.c.bf16 %v1174_v47, %v1172_v46  ;;  %v1070_v34 = vpop.f32.mrb[36].mxu1  ;;  %3051 = vmatprep.subr.bf16.mxu0 %v3235_v43  ;;  %3159 = vmatprep.subr.bf16.mxu1 %v3235_v43 }
 0x20b   : > { %v1071_v50 = vadd.f32 %v1070_v34, %v3655_v44  ;;  %v1072_v51 = vpop.f32.mrb[37].mxu1  ;;  %3052 = vmatpush3.bf16.msra.mxu0 %v3235_v43  ;;  %3163 = vmatpush3.bf16.msra.mxu1 %v3235_v43 }
 0x20c   : > { %v1073_v52 = vadd.f32 %v1072_v51, %v3657_v45  ;;  %v1074_v53 = vpop.f32.mrb[38].mxu1  ;;  %1466 = vmatprep.mubr.bf16.mxu0 %v1220_v49 }
 0x20d   : > { %v1075_v54 = vadd.f32 %v1074_v53, %v3655_v44  ;;  %v1076_v55 = vpop.f32.mrb[39].mxu1  ;;  %1467 = vmatmul.mubr.bf16.gmra.mrb[64].mxu0 %v1219_v48  ;;  %v1175_v57 = vmax.f32 %v1071_v50, 0.0 }
 0x20e   : > { %v1077_v56 = vadd.f32 %v1076_v55, %v3657_v45  ;;  %v1176_v59 = vmax.f32 %v1073_v52, 0.0  ;;  %v3236_v52 = vld [vmem:[%s4020_s7 + $0x18] sm:$0xff]  }
 0x20f   : > { %v1177_v58 = vmax.f32 %v1075_v54, 0.0  ;;  %3053 = vmatprep.subr.bf16.mxu0 %v3236_v52  ;;  %3160 = vmatprep.subr.bf16.mxu1 %v3236_v52 }
 0x210   : > { %v1178_v60 = vmax.f32 %v1077_v56, 0.0  ;;  %3054 = vmatpush3.bf16.msra.mxu0 %v3236_v52  ;;  %3164 = vmatpush3.bf16.msra.mxu1 %v3236_v52 }
 0x211   : > { %v1221_v61 = vpack.c.bf16 %v1177_v58, %v1175_v57 }
 0x212   : > { %v1222_v62 = vpack.c.bf16 %v1178_v60, %v1176_v59  ;;  %v1080_v63 = vpop.f32.mrb[40].mxu1 }
 0x213   : > { %v1081_v0 = vadd.f32 %v1080_v63, %v3655_v44  ;;  %v1082_v1 = vpop.f32.mrb[41].mxu1 }
 0x214   : > { %v1083_v2 = vadd.f32 %v1082_v1, %v3657_v45  ;;  %v1084_v3 = vpop.f32.mrb[42].mxu1  ;;  %1474 = vmatprep.mubr.bf16.mxu0 %v1222_v62 }
 0x215   : > { %v1085_v4 = vadd.f32 %v1084_v3, %v3655_v44  ;;  %v1086_v5 = vpop.f32.mrb[43].mxu1  ;;  %1475 = vmatmul.mubr.bf16.gmra.mrb[68].mxu0 %v1221_v61  ;;  %v1179_v7 = vmax.f32 %v1081_v0, 0.0 }
 0x216   : > { %v1087_v6 = vadd.f32 %v1086_v5, %v3657_v45  ;;  %v1180_v9 = vmax.f32 %v1083_v2, 0.0 }
 0x217   : > { %v1181_v8 = vmax.f32 %v1085_v4, 0.0 }
 0x218   : > { %v1182_v10 = vmax.f32 %v1087_v6, 0.0 }
 0x219   : > { %v1223_v11 = vpack.c.bf16 %v1181_v8, %v1179_v7 }
 0x21a   : > { %v1224_v12 = vpack.c.bf16 %v1182_v10, %v1180_v9  ;;  %v1090_v13 = vpop.f32.mrb[44].mxu1 }
 0x21b   : > { %v1091_v14 = vadd.f32 %v1090_v13, %v3655_v44  ;;  %v1092_v15 = vpop.f32.mrb[45].mxu1 }
 0x21c   : > { %v1093_v16 = vadd.f32 %v1092_v15, %v3657_v45  ;;  %v1094_v17 = vpop.f32.mrb[46].mxu1  ;;  %1482 = vmatprep.mubr.bf16.mxu0 %v1224_v12 }
 0x21d   : > { %v1095_v18 = vadd.f32 %v1094_v17, %v3655_v44  ;;  %v1096_v19 = vpop.f32.mrb[47].mxu1  ;;  %1483 = vmatmul.mubr.bf16.gmra.mrb[72].mxu0 %v1223_v11  ;;  %v1183_v21 = vmax.f32 %v1091_v14, 0.0 }
 0x21e   : > { %v1097_v20 = vadd.f32 %v1096_v19, %v3657_v45  ;;  %v1184_v23 = vmax.f32 %v1093_v16, 0.0 }
 0x21f   : > { %v1185_v22 = vmax.f32 %v1095_v18, 0.0 }
 0x220   : > { %v1186_v24 = vmax.f32 %v1097_v20, 0.0 }
 0x221   : > { %v1225_v25 = vpack.c.bf16 %v1185_v22, %v1183_v21 }
 0x222   : > { %v1226_v26 = vpack.c.bf16 %v1186_v24, %v1184_v23  ;;  %v1100_v27 = vpop.f32.mrb[48].mxu1  ;;  %v3738_v24 = vld [vmem:[%s4019_s6] ss:$0 sm:$0xff] }
 0x223   : > { %v1101_v28 = vadd.f32 %v1100_v27, %v3655_v44  ;;  %v1102_v29 = vpop.f32.mrb[49].mxu1 }
 0x224   : > { %v1103_v30 = vadd.f32 %v1102_v29, %v3657_v45  ;;  %v1104_v31 = vpop.f32.mrb[50].mxu1  ;;  %1490 = vmatprep.mubr.bf16.mxu0 %v1226_v26 }
 0x225   : > { %v1105_v32 = vadd.f32 %v1104_v31, %v3655_v44  ;;  %v1106_v33 = vpop.f32.mrb[51].mxu1  ;;  %1491 = vmatmul.mubr.bf16.gmra.mrb[76].mxu0 %v1225_v25  ;;  %v1187_v37 = vmax.f32 %v1101_v28, 0.0 }
 0x226   : > { %v1107_v36 = vadd.f32 %v1106_v33, %v3657_v45  ;;  %v1188_v38 = vmax.f32 %v1103_v30, 0.0 }
 0x227   : > { %v1189_v35 = vmax.f32 %v1105_v32, 0.0 }
 0x228   : > { %v1190_v39 = vmax.f32 %v1107_v36, 0.0 }
 0x229   : > { %v1227_v40 = vpack.c.bf16 %v1189_v35, %v1187_v37 }
 0x22a   : > { %v1228_v41 = vpack.c.bf16 %v1190_v39, %v1188_v38  ;;  %v1110_v42 = vpop.f32.mrb[52].mxu1 }
 0x22b   : > { %v1111_v46 = vadd.f32 %v1110_v42, %v3655_v44  ;;  %v1112_v47 = vpop.f32.mrb[53].mxu1 }
 0x22c   : > { %v1113_v48 = vadd.f32 %v1112_v47, %v3657_v45  ;;  %v1114_v49 = vpop.f32.mrb[54].mxu1  ;;  %1498 = vmatprep.mubr.bf16.mxu0 %v1228_v41 }
 0x22d   : > { %v1115_v34 = vadd.f32 %v1114_v49, %v3655_v44  ;;  %v1116_v50 = vpop.f32.mrb[55].mxu1  ;;  %1499 = vmatmul.mubr.bf16.gmra.mrb[80].mxu0 %v1227_v40  ;;  %v1191_v53 = vmax.f32 %v1111_v46, 0.0 }
 0x22e   : > { %v1117_v51 = vadd.f32 %v1116_v50, %v3657_v45  ;;  %v1192_v55 = vmax.f32 %v1113_v48, 0.0 }
 0x22f   : > { %v1193_v54 = vmax.f32 %v1115_v34, 0.0 }
 0x230   : > { %v1194_v56 = vmax.f32 %v1117_v51, 0.0 }
 0x231   : > { %v1229_v57 = vpack.c.bf16 %v1193_v54, %v1191_v53 }
 0x232   : > { %v1230_v58 = vpack.c.bf16 %v1194_v56, %v1192_v55  ;;  %v1120_v59 = vpop.f32.mrb[56].mxu1 }
 0x233   : > { %v1121_v60 = vadd.f32 %v1120_v59, %v3655_v44  ;;  %v1122_v61 = vpop.f32.mrb[57].mxu1 }
 0x234   : > { %v1123_v62 = vadd.f32 %v1122_v61, %v3657_v45  ;;  %v1124_v63 = vpop.f32.mrb[58].mxu1  ;;  %1506 = vmatprep.mubr.bf16.mxu0 %v1230_v58 }
 0x235   : > { %v1125_v0 = vadd.f32 %v1124_v63, %v3655_v44  ;;  %v1126_v1 = vpop.f32.mrb[59].mxu1  ;;  %1507 = vmatmul.mubr.bf16.gmra.mrb[84].mxu0 %v1229_v57  ;;  %v1195_v3 = vmax.f32 %v1121_v60, 0.0 }
 0x236   : > { %v1127_v2 = vadd.f32 %v1126_v1, %v3657_v45  ;;  %v1196_v5 = vmax.f32 %v1123_v62, 0.0 }
 0x237   : > { %v1197_v4 = vmax.f32 %v1125_v0, 0.0 }
 0x238   : > { %v1198_v6 = vmax.f32 %v1127_v2, 0.0 }
 0x239   : > { %v1231_v7 = vpack.c.bf16 %v1197_v4, %v1195_v3 }
 0x23a   : > { %v1232_v8 = vpack.c.bf16 %v1198_v6, %v1196_v5  ;;  %v1130_v9 = vpop.f32.mrb[60].mxu1 }
 0x23b   : > { %v1131_v10 = vadd.f32 %v1130_v9, %v3655_v44  ;;  %v1132_v11 = vpop.f32.mrb[61].mxu1 }
 0x23c   : > { %v1133_v12 = vadd.f32 %v1132_v11, %v3657_v45  ;;  %v1134_v13 = vpop.f32.mrb[62].mxu1  ;;  %1514 = vmatprep.mubr.bf16.mxu0 %v1232_v8 }
 0x23d   : > { %v1135_v14 = vadd.f32 %v1134_v13, %v3655_v44  ;;  %v1136_v15 = vpop.f32.mrb[63].mxu1  ;;  %1515 = vmatmul.mubr.bf16.gmra.mrb[88].mxu0 %v1231_v7  ;;  %v1199_v17 = vmax.f32 %v1131_v10, 0.0 }
 0x23e   : > { %v1137_v16 = vadd.f32 %v1136_v15, %v3657_v45  ;;  %v1200_v19 = vmax.f32 %v1133_v12, 0.0 }
 0x23f   : > { %v1201_v18 = vmax.f32 %v1135_v14, 0.0 }
 0x240   : > { %v1202_v20 = vmax.f32 %v1137_v16, 0.0 }
 0x241   : > { %v1233_v21 = vpack.c.bf16 %v1201_v18, %v1199_v17 }
 0x242   : > { %v1234_v22 = vpack.c.bf16 %v1202_v20, %v1200_v19 }
 0x244   : > { %1522 = vmatprep.mubr.bf16.mxu0 %v1234_v22 }
 0x245   : > { %1523 = vmatmul.mubr.bf16.gmra.mrb[92].mxu0 %v1233_v21 }
 0x2a0   : > { %v2860_v23 = vpop.f32.mrb[32].mxu0 }
 0x2a1   : > { %v2861_v25 = vpop.f32.mrb[33].mxu0 }
 0x2a2   : > { %v2862_v44 = vadd.f32 %v2861_v25, %v2860_v23  ;;  %v2863_v26 = vpop.f32.mrb[34].mxu0 }
 0x2a3   : > { %v2864_v27 = vpop.f32.mrb[35].mxu0 }
 0x2a4   : > { %v1405_v45 = vadd.f32 %v2862_v44, %v3738_v24  ;;  %v2865_v28 = vadd.f32 %v2864_v27, %v2863_v26 }
 0x2a6   : > { %v1408_v29 = vadd.f32 %v2865_v28, %v3738_v24  ;;  %v1531_v30 = vmax.f32 %v1405_v45, 0.0 }
 0x2a8   : > { %v1532_v31 = vmax.f32 %v1408_v29, 0.0  ;;  %v2866_v32 = vpop.f32.mrb[36].mxu0 }
 0x2a9   : > { %v2867_v33 = vpop.f32.mrb[37].mxu0 }
 0x2aa   : > { %v1563_v36 = vpack.c.bf16 %v1532_v31, %v1531_v30  ;;  %v2868_v37 = vadd.f32 %v2867_v33, %v2866_v32  ;;  %v2869_v35 = vpop.f32.mrb[38].mxu0 }
 0x2ab   : > { %v2870_v38 = vpop.f32.mrb[39].mxu0 }
 0x2ac   : > { %v1413_v39 = vadd.f32 %v2868_v37, %v3738_v24  ;;  %v2871_v40 = vadd.f32 %v2870_v38, %v2869_v35  ;;  %3055 = vmatprep.mubr.msk.bf16.mxu0 %vm1618_vm1, %v1563_v36 }
 0x2ae   : > { %v1416_v41 = vadd.f32 %v2871_v40, %v3738_v24  ;;  %v1533_v42 = vmax.f32 %v1413_v39, 0.0 }
 0x2b0   : > { %v1534_v43 = vmax.f32 %v1416_v41, 0.0  ;;  %v2872_v46 = vpop.f32.mrb[40].mxu0 }
 0x2b1   : > { %v2873_v47 = vpop.f32.mrb[41].mxu0 }
 0x2b2   : > { %v1564_v48 = vpack.c.bf16 %v1534_v43, %v1533_v42  ;;  %v2874_v49 = vadd.f32 %v2873_v47, %v2872_v46  ;;  %v2875_v34 = vpop.f32.mrb[42].mxu0 }
 0x2b3   : > { %v2876_v50 = vpop.f32.mrb[43].mxu0 }
 0x2b4   : > { %v1421_v51 = vadd.f32 %v2874_v49, %v3738_v24  ;;  %v2877_v52 = vadd.f32 %v2876_v50, %v2875_v34  ;;  %3056 = vmatmul.mubr.msk.bf16.vlgmr.msra.gmra.mrb[96].mxu0 %vm1618_vm1, %v1564_v48 }
 0x2b6   : > { %v1424_v53 = vadd.f32 %v2877_v52, %v3738_v24  ;;  %v1535_v54 = vmax.f32 %v1421_v51, 0.0 }
 0x2b8   : > { %v1536_v55 = vmax.f32 %v1424_v53, 0.0  ;;  %v2878_v56 = vpop.f32.mrb[44].mxu0 }
 0x2b9   : > { %v2879_v57 = vpop.f32.mrb[45].mxu0 }
 0x2ba   : > { %v1565_v58 = vpack.c.bf16 %v1536_v55, %v1535_v54  ;;  %v2880_v59 = vadd.f32 %v2879_v57, %v2878_v56  ;;  %v2881_v60 = vpop.f32.mrb[46].mxu0 }
 0x2bb   : > { %v2882_v61 = vpop.f32.mrb[47].mxu0 }
 0x2bc   : > { %v1429_v62 = vadd.f32 %v2880_v59, %v3738_v24  ;;  %v2883_v63 = vadd.f32 %v2882_v61, %v2881_v60  ;;  %3059 = vmatprep.mubr.msk.bf16.mxu1 %vm1618_vm1, %v1565_v58 }
 0x2be   : > { %v1432_v0 = vadd.f32 %v2883_v63, %v3738_v24  ;;  %v1537_v1 = vmax.f32 %v1429_v62, 0.0 }
 0x2c0   : > { %v1538_v2 = vmax.f32 %v1432_v0, 0.0  ;;  %v2884_v3 = vpop.f32.mrb[48].mxu0 }
 0x2c1   : > { %v2885_v4 = vpop.f32.mrb[49].mxu0 }
 0x2c2   : > { %v1566_v5 = vpack.c.bf16 %v1538_v2, %v1537_v1  ;;  %v2886_v6 = vadd.f32 %v2885_v4, %v2884_v3  ;;  %v2887_v7 = vpop.f32.mrb[50].mxu0 }
 0x2c3   : > { %v2888_v8 = vpop.f32.mrb[51].mxu0 }
 0x2c4   : > { %v1437_v9 = vadd.f32 %v2886_v6, %v3738_v24  ;;  %v2889_v10 = vadd.f32 %v2888_v8, %v2887_v7  ;;  %3060 = vmatmul.mubr.msk.bf16.vlgmr.msra.gmra.mrb[64].mxu1 %vm1618_vm1, %v1566_v5 }
 0x2c6   : > { %v1440_v11 = vadd.f32 %v2889_v10, %v3738_v24  ;;  %v1539_v12 = vmax.f32 %v1437_v9, 0.0 }
 0x2c8   : > { %v1540_v13 = vmax.f32 %v1440_v11, 0.0  ;;  %v2890_v14 = vpop.f32.mrb[52].mxu0 }
 0x2c9   : > { %v2891_v15 = vpop.f32.mrb[53].mxu0 }
 0x2ca   : > { %v1567_v16 = vpack.c.bf16 %v1540_v13, %v1539_v12  ;;  %v2892_v17 = vadd.f32 %v2891_v15, %v2890_v14  ;;  %v2893_v18 = vpop.f32.mrb[54].mxu0 }
 0x2cb   : > { %v2894_v19 = vpop.f32.mrb[55].mxu0 }
 0x2cc   : > { %v1445_v20 = vadd.f32 %v2892_v17, %v3738_v24  ;;  %v2895_v21 = vadd.f32 %v2894_v19, %v2893_v18  ;;  %3063 = vmatprep.mubr.msk.bf16.mxu1 %vm1618_vm1, %v1567_v16 }
 0x2ce   : > { %v1448_v22 = vadd.f32 %v2895_v21, %v3738_v24  ;;  %v1541_v23 = vmax.f32 %v1445_v20, 0.0 }
 0x2d0   : > { %v1542_v25 = vmax.f32 %v1448_v22, 0.0  ;;  %v2896_v44 = vpop.f32.mrb[56].mxu0 }
 0x2d1   : > { %v2897_v26 = vpop.f32.mrb[57].mxu0 }
 0x2d2   : > { %v1568_v27 = vpack.c.bf16 %v1542_v25, %v1541_v23  ;;  %v2898_v45 = vadd.f32 %v2897_v26, %v2896_v44  ;;  %v2899_v28 = vpop.f32.mrb[58].mxu0 }
 0x2d3   : > { %v2900_v29 = vpop.f32.mrb[59].mxu0 }
 0x2d4   : > { %v1453_v30 = vadd.f32 %v2898_v45, %v3738_v24  ;;  %v2901_v31 = vadd.f32 %v2900_v29, %v2899_v28  ;;  %3064 = vmatmul.mubr.msk.bf16.gmra.mrb[68].mxu1 %vm1618_vm1, %v1568_v27 }
 0x2d6   : > { %v1456_v32 = vadd.f32 %v2901_v31, %v3738_v24  ;;  %v1543_v33 = vmax.f32 %v1453_v30, 0.0 }
 0x2d8   : > { %v1544_v36 = vmax.f32 %v1456_v32, 0.0  ;;  %v2902_v37 = vpop.f32.mrb[60].mxu0 }
 0x2d9   : > { %v2903_v35 = vpop.f32.mrb[61].mxu0 }
 0x2da   : > { %v1569_v38 = vpack.c.bf16 %v1544_v36, %v1543_v33  ;;  %v2904_v39 = vadd.f32 %v2903_v35, %v2902_v37  ;;  %v2905_v40 = vpop.f32.mrb[62].mxu0 }
 0x2db   : > { %v2906_v41 = vpop.f32.mrb[63].mxu0 }
 0x2dc   : > { %v1461_v42 = vadd.f32 %v2904_v39, %v3738_v24  ;;  %v2907_v43 = vadd.f32 %v2906_v41, %v2905_v40  ;;  %3067 = vmatprep.mubr.msk.bf16.mxu1 %vm1618_vm1, %v1569_v38  ;;  %v3237_v40 = vld [vmem:[%s4022_s9] sm:$0xff]  }
 0x2dd   : > { %3087 = vmatprep.subr.bf16.mxu0 %v3237_v40 }
 0x2de   : > { %v1464_v46 = vadd.f32 %v2907_v43, %v3738_v24  ;;  %v1545_v47 = vmax.f32 %v1461_v42, 0.0  ;;  %3088 = vmatpush3.bf16.msra.mxu0 %v3237_v40 }
 0x2e0   : > { %v1546_v48 = vmax.f32 %v1464_v46, 0.0  ;;  %v2908_v49 = vpop.f32.mrb[64].mxu0 }
 0x2e1   : > { %v2909_v34 = vpop.f32.mrb[65].mxu0 }
 0x2e2   : > { %v1570_v50 = vpack.c.bf16 %v1546_v48, %v1545_v47  ;;  %v2910_v51 = vadd.f32 %v2909_v34, %v2908_v49  ;;  %v2911_v52 = vpop.f32.mrb[66].mxu0  ;;  %v3238_v34 = vld [vmem:[%s4022_s9 + $0x8] sm:$0xff]  }
 0x2e3   : > { %v2912_v53 = vpop.f32.mrb[67].mxu0  ;;  %3089 = vmatprep.subr.bf16.mxu0 %v3238_v34 }
 0x2e4   : > { %v1469_v54 = vadd.f32 %v2910_v51, %v3738_v24  ;;  %v2913_v55 = vadd.f32 %v2912_v53, %v2911_v52  ;;  %3068 = vmatmul.mubr.msk.bf16.gmra.mrb[72].mxu1 %vm1618_vm1, %v1570_v50  ;;  %3090 = vmatpush3.bf16.msra.mxu0 %v3238_v34 }
 0x2e6   : > { %v1472_v56 = vadd.f32 %v2913_v55, %v3738_v24  ;;  %v1547_v57 = vmax.f32 %v1469_v54, 0.0 }
 0x2e8   : > { %v1548_v58 = vmax.f32 %v1472_v56, 0.0  ;;  %v2914_v59 = vpop.f32.mrb[68].mxu0 }
 0x2e9   : > { %v2915_v60 = vpop.f32.mrb[69].mxu0 }
 0x2ea   : > { %v1571_v61 = vpack.c.bf16 %v1548_v58, %v1547_v57  ;;  %v2916_v62 = vadd.f32 %v2915_v60, %v2914_v59  ;;  %v2917_v63 = vpop.f32.mrb[70].mxu0 }
 0x2eb   : > { %v2918_v0 = vpop.f32.mrb[71].mxu0 }
 0x2ec   : > { %v1477_v1 = vadd.f32 %v2916_v62, %v3738_v24  ;;  %v2919_v2 = vadd.f32 %v2918_v0, %v2917_v63  ;;  %3071 = vmatprep.mubr.msk.bf16.mxu1 %vm1618_vm1, %v1571_v61 }
 0x2ee   : > { %v1480_v3 = vadd.f32 %v2919_v2, %v3738_v24  ;;  %v1549_v4 = vmax.f32 %v1477_v1, 0.0 }
 0x2f0   : > { %v1550_v5 = vmax.f32 %v1480_v3, 0.0  ;;  %v2920_v6 = vpop.f32.mrb[72].mxu0 }
 0x2f1   : > { %v2921_v7 = vpop.f32.mrb[73].mxu0 }
 0x2f2   : > { %v1572_v8 = vpack.c.bf16 %v1550_v5, %v1549_v4  ;;  %v2922_v9 = vadd.f32 %v2921_v7, %v2920_v6  ;;  %v2923_v10 = vpop.f32.mrb[74].mxu0 }
 0x2f3   : > { %v2924_v11 = vpop.f32.mrb[75].mxu0 }
 0x2f4   : > { %v1485_v12 = vadd.f32 %v2922_v9, %v3738_v24  ;;  %v2925_v13 = vadd.f32 %v2924_v11, %v2923_v10  ;;  %3072 = vmatmul.mubr.msk.bf16.gmra.mrb[76].mxu1 %vm1618_vm1, %v1572_v8 }
 0x2f6   : > { %v1488_v14 = vadd.f32 %v2925_v13, %v3738_v24  ;;  %v1551_v15 = vmax.f32 %v1485_v12, 0.0  ;;  %v3797_v12 = vld [vmem:[%s4021_s8] ss:$0 sm:$0xff] }
 0x2f8   : > { %v1552_v16 = vmax.f32 %v1488_v14, 0.0  ;;  %v2926_v17 = vpop.f32.mrb[76].mxu0 }
 0x2f9   : > { %v2927_v18 = vpop.f32.mrb[77].mxu0 }
 0x2fa   : > { %v1573_v19 = vpack.c.bf16 %v1552_v16, %v1551_v15  ;;  %v2928_v20 = vadd.f32 %v2927_v18, %v2926_v17  ;;  %v2929_v21 = vpop.f32.mrb[78].mxu0 }
 0x2fb   : > { %v2930_v22 = vpop.f32.mrb[79].mxu0 }
 0x2fc   : > { %v1493_v23 = vadd.f32 %v2928_v20, %v3738_v24  ;;  %v2931_v25 = vadd.f32 %v2930_v22, %v2929_v21  ;;  %3075 = vmatprep.mubr.msk.bf16.mxu1 %vm1618_vm1, %v1573_v19 }
 0x2fe   : > { %v1496_v44 = vadd.f32 %v2931_v25, %v3738_v24  ;;  %v1553_v26 = vmax.f32 %v1493_v23, 0.0 }
 0x300   : > { %v1554_v27 = vmax.f32 %v1496_v44, 0.0  ;;  %v2932_v45 = vpop.f32.mrb[80].mxu0 }
 0x301   : > { %v2933_v28 = vpop.f32.mrb[81].mxu0 }
 0x302   : > { %v1574_v29 = vpack.c.bf16 %v1554_v27, %v1553_v26  ;;  %v2934_v30 = vadd.f32 %v2933_v28, %v2932_v45  ;;  %v2935_v31 = vpop.f32.mrb[82].mxu0 }
 0x303   : > { %v2936_v32 = vpop.f32.mrb[83].mxu0 }
 0x304   : > { %v1501_v33 = vadd.f32 %v2934_v30, %v3738_v24  ;;  %v2937_v36 = vadd.f32 %v2936_v32, %v2935_v31  ;;  %3076 = vmatmul.mubr.msk.bf16.gmra.mrb[80].mxu1 %vm1618_vm1, %v1574_v29 }
 0x306   : > { %v1504_v37 = vadd.f32 %v2937_v36, %v3738_v24  ;;  %v1555_v35 = vmax.f32 %v1501_v33, 0.0 }
 0x308   : > { %v1556_v38 = vmax.f32 %v1504_v37, 0.0  ;;  %v2938_v39 = vpop.f32.mrb[84].mxu0 }
 0x309   : > { %v2939_v41 = vpop.f32.mrb[85].mxu0 }
 0x30a   : > { %v1575_v42 = vpack.c.bf16 %v1556_v38, %v1555_v35  ;;  %v2940_v43 = vadd.f32 %v2939_v41, %v2938_v39  ;;  %v2941_v46 = vpop.f32.mrb[86].mxu0 }
 0x30b   : > { %v2942_v47 = vpop.f32.mrb[87].mxu0 }
 0x30c   : > { %v1509_v48 = vadd.f32 %v2940_v43, %v3738_v24  ;;  %v2943_v49 = vadd.f32 %v2942_v47, %v2941_v46  ;;  %3079 = vmatprep.mubr.msk.bf16.mxu1 %vm1618_vm1, %v1575_v42 }
 0x30e   : > { %v1512_v50 = vadd.f32 %v2943_v49, %v3738_v24  ;;  %v1557_v51 = vmax.f32 %v1509_v48, 0.0 }
 0x310   : > { %v1558_v52 = vmax.f32 %v1512_v50, 0.0  ;;  %v2944_v53 = vpop.f32.mrb[88].mxu0 }
 0x311   : > { %v2945_v54 = vpop.f32.mrb[89].mxu0 }
 0x312   : > { %v1576_v55 = vpack.c.bf16 %v1558_v52, %v1557_v51  ;;  %v2946_v56 = vadd.f32 %v2945_v54, %v2944_v53  ;;  %v2947_v57 = vpop.f32.mrb[90].mxu0 }
 0x313   : > { %v2948_v58 = vpop.f32.mrb[91].mxu0 }
 0x314   : > { %v1517_v59 = vadd.f32 %v2946_v56, %v3738_v24  ;;  %v2949_v60 = vadd.f32 %v2948_v58, %v2947_v57  ;;  %3080 = vmatmul.mubr.msk.bf16.gmra.mrb[84].mxu1 %vm1618_vm1, %v1576_v55 }
 0x316   : > { %v1520_v61 = vadd.f32 %v2949_v60, %v3738_v24  ;;  %v1559_v62 = vmax.f32 %v1517_v59, 0.0 }
 0x318   : > { %v1560_v63 = vmax.f32 %v1520_v61, 0.0  ;;  %v2950_v0 = vpop.f32.mrb[92].mxu0 }
 0x319   : > { %v2951_v1 = vpop.f32.mrb[93].mxu0 }
 0x31a   : > { %v1577_v2 = vpack.c.bf16 %v1560_v63, %v1559_v62  ;;  %v2952_v3 = vadd.f32 %v2951_v1, %v2950_v0  ;;  %v2953_v4 = vpop.f32.mrb[94].mxu0 }
 0x31b   : > { %v2954_v5 = vpop.f32.mrb[95].mxu0 }
 0x31c   : > { %v1525_v6 = vadd.f32 %v2952_v3, %v3738_v24  ;;  %v2955_v7 = vadd.f32 %v2954_v5, %v2953_v4  ;;  %3083 = vmatprep.mubr.msk.bf16.mxu1 %vm1618_vm1, %v1577_v2 }
 0x31e   : > { %v1528_v8 = vadd.f32 %v2955_v7, %v3738_v24  ;;  %v1561_v9 = vmax.f32 %v1525_v6, 0.0 }
 0x320   : > { %v1562_v10 = vmax.f32 %v1528_v8, 0.0 }
 0x322   : > { %v1578_v11 = vpack.c.bf16 %v1562_v10, %v1561_v9 }
 0x324   : > { %3084 = vmatmul.mubr.msk.bf16.gmra.mrb[88].mxu1 %vm1618_vm1, %v1578_v11 }
 0x387   : > { %v3057_v13 = vpop.f32.mrb[96].mxu0 }
 0x388   : > { %v1710_v14 = vadd.f32 %v3057_v13, %v3797_v12  ;;  %v1701_v15 = vpop.f32.mrb[97].mxu0 }
 0x389   : > { %v1702_v16 = vadd.f32 %v3797_v12, %v1701_v15  ;;  %v3058_v17 = vpop.f32.mrb[98].mxu0 }
 0x38a   : > { %v1713_v18 = vadd.f32 %v3058_v17, %v3797_v12  ;;  %v1704_v24 = vpop.f32.mrb[99].mxu0  ;;  %v1830_v20 = vmax.f32 %v1710_v14, 0.0 }
 0x38b   : > { %v1705_v19 = vadd.f32 %v3797_v12, %v1704_v24  ;;  %v1828_v22 = vmax.f32 %v1702_v16, 0.0 }
 0x38c   : > { %v1831_v21 = vmax.f32 %v1713_v18, 0.0 }
 0x38d   : > { %v1829_v23 = vmax.f32 %v1705_v19, 0.0 }
 0x38e   : > { %v1861_v25 = vpack.c.bf16 %v1831_v21, %v1830_v20 }
 0x38f   : > { %v1860_v44 = vpack.c.bf16 %v1829_v23, %v1828_v22 }
 0x391   : > { %3091 = vmatprep.mubr.msk.bf16.mxu0 %vm580_vm0, %v1860_v44 }
 0x392   : > { %3092 = vmatmul.mubr.msk.bf16.vlgmr.msra.gmra.mrb[100].mxu0 %vm580_vm0, %v1861_v25 }
 0x397   : > { %v3061_v26 = vpop.f32.mrb[64].mxu1 }
 0x398   : > { %v1726_v27 = vadd.f32 %v3061_v26, %v3797_v12  ;;  %v1717_v45 = vpop.f32.mrb[65].mxu1 }
 0x399   : > { %v1718_v28 = vadd.f32 %v3797_v12, %v1717_v45  ;;  %v3062_v29 = vpop.f32.mrb[66].mxu1 }
 0x39a   : > { %v1729_v30 = vadd.f32 %v3062_v29, %v3797_v12  ;;  %v1720_v31 = vpop.f32.mrb[67].mxu1  ;;  %v1834_v33 = vmax.f32 %v1726_v27, 0.0 }
 0x39b   : > { %v1721_v32 = vadd.f32 %v3797_v12, %v1720_v31  ;;  %v1832_v37 = vmax.f32 %v1718_v28, 0.0 }
 0x39c   : > { %v1835_v36 = vmax.f32 %v1729_v30, 0.0 }
 0x39d   : > { %v1833_v35 = vmax.f32 %v1721_v32, 0.0 }
 0x39e   : > { %v1863_v38 = vpack.c.bf16 %v1835_v36, %v1834_v33 }
 0x39f   : > { %v1862_v39 = vpack.c.bf16 %v1833_v35, %v1832_v37 }
 0x3a1   : > { %3095 = vmatprep.mubr.msk.bf16.mxu0 %vm580_vm0, %v1862_v39 }
 0x3a2   : > { %3096 = vmatmul.mubr.msk.bf16.gmra.mrb[104].mxu0 %vm580_vm0, %v1863_v38 }
 0x3a7   : > { %v3065_v40 = vpop.f32.mrb[68].mxu1 }
 0x3a8   : > { %v1742_v41 = vadd.f32 %v3065_v40, %v3797_v12  ;;  %v1733_v42 = vpop.f32.mrb[69].mxu1 }
 0x3a9   : > { %v1734_v43 = vadd.f32 %v3797_v12, %v1733_v42  ;;  %v3066_v46 = vpop.f32.mrb[70].mxu1 }
 0x3aa   : > { %v1745_v47 = vadd.f32 %v3066_v46, %v3797_v12  ;;  %v1736_v48 = vpop.f32.mrb[71].mxu1  ;;  %v1838_v34 = vmax.f32 %v1742_v41, 0.0  ;;  %v2156_v41 = vld [vmem:[%s4024_s11] sm:$0xf] }
 0x3ab   : > { %v1737_v49 = vadd.f32 %v3797_v12, %v1736_v48  ;;  %v1836_v51 = vmax.f32 %v1734_v43, 0.0  ;;  %3165 = vmatprep.subr.msk.bf16.mxu1 %vm2213_vm2, %v2156_v41  ;;  %v2215_v46 = vsel %vm2213_vm2, %v2156_v41, 0 }
 0x3ac   : > { %v1839_v50 = vmax.f32 %v1745_v47, 0.0  ;;  %3124 = vmatpush3.bf16.msra.mxu1 %v2215_v46 }
 0x3ad   : > { %v1837_v52 = vmax.f32 %v1737_v49, 0.0 }
 0x3ae   : > { %v1865_v53 = vpack.c.bf16 %v1839_v50, %v1838_v34 }
 0x3af   : > { %v1864_v54 = vpack.c.bf16 %v1837_v52, %v1836_v51 }
 0x3b1   : > { %3099 = vmatprep.mubr.msk.bf16.mxu0 %vm580_vm0, %v1864_v54 }
 0x3b2   : > { %3100 = vmatmul.mubr.msk.bf16.gmra.mrb[108].mxu0 %vm580_vm0, %v1865_v53 }
 0x3b7   : > { %v3069_v55 = vpop.f32.mrb[72].mxu1 }
 0x3b8   : > { %v1758_v56 = vadd.f32 %v3069_v55, %v3797_v12  ;;  %v1749_v57 = vpop.f32.mrb[73].mxu1 }
 0x3b9   : > { %v1750_v58 = vadd.f32 %v3797_v12, %v1749_v57  ;;  %v3070_v59 = vpop.f32.mrb[74].mxu1 }
 0x3ba   : > { %v1761_v60 = vadd.f32 %v3070_v59, %v3797_v12  ;;  %v1752_v61 = vpop.f32.mrb[75].mxu1  ;;  %v1842_v63 = vmax.f32 %v1758_v56, 0.0 }
 0x3bb   : > { %v1753_v62 = vadd.f32 %v3797_v12, %v1752_v61  ;;  %v1840_v1 = vmax.f32 %v1750_v58, 0.0 }
 0x3bc   : > { %v1843_v0 = vmax.f32 %v1761_v60, 0.0 }
 0x3bd   : > { %v1841_v2 = vmax.f32 %v1753_v62, 0.0 }
 0x3be   : > { %v1867_v3 = vpack.c.bf16 %v1843_v0, %v1842_v63  ;;  %v3853_v0 = vld [vmem:[%s4023_s10] ss:$0 sm:$0xff] }
 0x3bf   : > { %v1866_v4 = vpack.c.bf16 %v1841_v2, %v1840_v1 }
 0x3c1   : > { %3103 = vmatprep.mubr.msk.bf16.mxu0 %vm580_vm0, %v1866_v4 }
 0x3c2   : > { %3104 = vmatmul.mubr.msk.bf16.gmra.mrb[112].mxu0 %vm580_vm0, %v1867_v3 }
 0x3c7   : > { %v3073_v5 = vpop.f32.mrb[76].mxu1 }
 0x3c8   : > { %v1774_v6 = vadd.f32 %v3073_v5, %v3797_v12  ;;  %v1765_v7 = vpop.f32.mrb[77].mxu1 }
 0x3c9   : > { %v1766_v8 = vadd.f32 %v3797_v12, %v1765_v7  ;;  %v3074_v9 = vpop.f32.mrb[78].mxu1 }
 0x3ca   : > { %v1777_v10 = vadd.f32 %v3074_v9, %v3797_v12  ;;  %v1768_v11 = vpop.f32.mrb[79].mxu1  ;;  %v1846_v14 = vmax.f32 %v1774_v6, 0.0 }
 0x3cb   : > { %v1769_v13 = vadd.f32 %v3797_v12, %v1768_v11  ;;  %v1844_v16 = vmax.f32 %v1766_v8, 0.0 }
 0x3cc   : > { %v1847_v15 = vmax.f32 %v1777_v10, 0.0 }
 0x3cd   : > { %v1845_v17 = vmax.f32 %v1769_v13, 0.0 }
 0x3ce   : > { %v1869_v18 = vpack.c.bf16 %v1847_v15, %v1846_v14 }
 0x3cf   : > { %v1868_v24 = vpack.c.bf16 %v1845_v17, %v1844_v16 }
 0x3d1   : > { %3107 = vmatprep.mubr.msk.bf16.mxu0 %vm580_vm0, %v1868_v24 }
 0x3d2   : > { %3108 = vmatmul.mubr.msk.bf16.gmra.mrb[116].mxu0 %vm580_vm0, %v1869_v18 }
 0x3d7   : > { %v3077_v19 = vpop.f32.mrb[80].mxu1 }
 0x3d8   : > { %v1790_v20 = vadd.f32 %v3077_v19, %v3797_v12  ;;  %v1781_v21 = vpop.f32.mrb[81].mxu1 }
 0x3d9   : > { %v1782_v22 = vadd.f32 %v3797_v12, %v1781_v21  ;;  %v3078_v23 = vpop.f32.mrb[82].mxu1 }
 0x3da   : > { %v1793_v25 = vadd.f32 %v3078_v23, %v3797_v12  ;;  %v1784_v44 = vpop.f32.mrb[83].mxu1  ;;  %v1850_v27 = vmax.f32 %v1790_v20, 0.0 }
 0x3db   : > { %v1785_v26 = vadd.f32 %v3797_v12, %v1784_v44  ;;  %v1848_v28 = vmax.f32 %v1782_v22, 0.0 }
 0x3dc   : > { %v1851_v45 = vmax.f32 %v1793_v25, 0.0 }
 0x3dd   : > { %v1849_v29 = vmax.f32 %v1785_v26, 0.0 }
 0x3de   : > { %v1871_v30 = vpack.c.bf16 %v1851_v45, %v1850_v27 }
 0x3df   : > { %v1870_v31 = vpack.c.bf16 %v1849_v29, %v1848_v28 }
 0x3e1   : > { %3111 = vmatprep.mubr.msk.bf16.mxu0 %vm580_vm0, %v1870_v31 }
 0x3e2   : > { %3112 = vmatmul.mubr.msk.bf16.gmra.mrb[120].mxu0 %vm580_vm0, %v1871_v30 }
 0x3e7   : > { %v3081_v32 = vpop.f32.mrb[84].mxu1 }
 0x3e8   : > { %v1806_v33 = vadd.f32 %v3081_v32, %v3797_v12  ;;  %v1797_v36 = vpop.f32.mrb[85].mxu1 }
 0x3e9   : > { %v1798_v37 = vadd.f32 %v3797_v12, %v1797_v36  ;;  %v3082_v35 = vpop.f32.mrb[86].mxu1 }
 0x3ea   : > { %v1809_v38 = vadd.f32 %v3082_v35, %v3797_v12  ;;  %v1800_v39 = vpop.f32.mrb[87].mxu1  ;;  %v1854_v42 = vmax.f32 %v1806_v33, 0.0 }
 0x3eb   : > { %v1801_v40 = vadd.f32 %v3797_v12, %v1800_v39  ;;  %v1852_v47 = vmax.f32 %v1798_v37, 0.0 }
 0x3ec   : > { %v1855_v43 = vmax.f32 %v1809_v38, 0.0 }
 0x3ed   : > { %v1853_v48 = vmax.f32 %v1801_v40, 0.0 }
 0x3ee   : > { %v1873_v49 = vpack.c.bf16 %v1855_v43, %v1854_v42 }
 0x3ef   : > { %v1872_v34 = vpack.c.bf16 %v1853_v48, %v1852_v47 }
 0x3f1   : > { %3115 = vmatprep.mubr.msk.bf16.mxu0 %vm580_vm0, %v1872_v34 }
 0x3f2   : > { %3116 = vmatmul.mubr.msk.bf16.gmra.mrb[124].mxu0 %vm580_vm0, %v1873_v49 }
 0x3f7   : > { %v3085_v50 = vpop.f32.mrb[88].mxu1 }
 0x3f8   : > { %v1822_v51 = vadd.f32 %v3085_v50, %v3797_v12  ;;  %v1813_v52 = vpop.f32.mrb[89].mxu1 }
 0x3f9   : > { %v1814_v53 = vadd.f32 %v3797_v12, %v1813_v52  ;;  %v3086_v54 = vpop.f32.mrb[90].mxu1 }
 0x3fa   : > { %v1825_v55 = vadd.f32 %v3086_v54, %v3797_v12  ;;  %v1816_v56 = vpop.f32.mrb[91].mxu1  ;;  %v1858_v58 = vmax.f32 %v1822_v51, 0.0 }
 0x3fb   : > { %v1817_v57 = vadd.f32 %v3797_v12, %v1816_v56  ;;  %v1856_v60 = vmax.f32 %v1814_v53, 0.0 }
 0x3fc   : > { %v1859_v59 = vmax.f32 %v1825_v55, 0.0 }
 0x3fd   : > { %v1857_v61 = vmax.f32 %v1817_v57, 0.0 }
 0x3fe   : > { %v1875_v62 = vpack.c.bf16 %v1859_v59, %v1858_v58 }
 0x3ff   : > { %v1874_v63 = vpack.c.bf16 %v1857_v61, %v1856_v60 }
 0x401   : > { %3119 = vmatprep.mubr.msk.bf16.mxu0 %vm580_vm0, %v1874_v63 }
 0x402   : > { %3120 = vmatmul.mubr.msk.bf16.gmra.mrb[128].mxu0 %vm580_vm0, %v1875_v62 }
 0x465   : > { %v3093_v1 = vpop.f32.mrb[100].mxu0 }
 0x466   : > { %v1990_v2 = vadd.f32 %v3093_v1, %v3853_v0  ;;  %v1981_v3 = vpop.f32.mrb[101].mxu0 }
 0x467   : > { %v1982_v12 = vadd.f32 %v3853_v0, %v1981_v3  ;;  %v3094_v4 = vpop.f32.mrb[102].mxu0 }
 0x468   : > { %v1993_v5 = vadd.f32 %v3094_v4, %v3853_v0  ;;  %v1984_v6 = vpop.f32.mrb[103].mxu0  ;;  %v2110_v8 = vmax.f32 %v1990_v2, 0.0 }
 0x469   : > { %v1985_v7 = vadd.f32 %v3853_v0, %v1984_v6  ;;  %v2108_v10 = vmax.f32 %v1982_v12, 0.0 }
 0x46a   : > { %v2111_v9 = vmax.f32 %v1993_v5, 0.0 }
 0x46b   : > { %v2109_v11 = vmax.f32 %v1985_v7, 0.0 }
 0x46c   : > { %v2141_v13 = vpack.c.bf16 %v2111_v9, %v2110_v8 }
 0x46d   : > { %v2140_v14 = vpack.c.bf16 %v2109_v11, %v2108_v10 }
 0x46f   : > { %3125 = vmatprep.mubr.msk.bf16.mxu1 %vm2164_vm3, %v2140_v14 }
 0x470   : > { %3126 = vmatmul.mubr.msk.bf16.vlgmr.msra.gmra.mrb[92].mxu1 %vm2164_vm3, %v2141_v13 }
 0x475   : > { %v3097_v15 = vpop.f32.mrb[104].mxu0 }
 0x476   : > { %v2006_v16 = vadd.f32 %v3097_v15, %v3853_v0  ;;  %v1997_v17 = vpop.f32.mrb[105].mxu0 }
 0x477   : > { %v1998_v18 = vadd.f32 %v3853_v0, %v1997_v17  ;;  %v3098_v24 = vpop.f32.mrb[106].mxu0 }
 0x478   : > { %v2009_v19 = vadd.f32 %v3098_v24, %v3853_v0  ;;  %v2000_v20 = vpop.f32.mrb[107].mxu0  ;;  %v2114_v22 = vmax.f32 %v2006_v16, 0.0 }
 0x479   : > { %v2001_v21 = vadd.f32 %v3853_v0, %v2000_v20  ;;  %v2112_v25 = vmax.f32 %v1998_v18, 0.0 }
 0x47a   : > { %v2115_v23 = vmax.f32 %v2009_v19, 0.0 }
 0x47b   : > { %v2113_v44 = vmax.f32 %v2001_v21, 0.0 }
 0x47c   : > { %v2143_v26 = vpack.c.bf16 %v2115_v23, %v2114_v22 }
 0x47d   : > { %v2142_v27 = vpack.c.bf16 %v2113_v44, %v2112_v25 }
 0x47f   : > { %3129 = vmatprep.mubr.msk.bf16.mxu1 %vm2164_vm3, %v2142_v27 }
 0x480   : > { %3130 = vmatmul.mubr.msk.bf16.gmra.mrb[96].mxu1 %vm2164_vm3, %v2143_v26 }
 0x485   : > { %v3101_v45 = vpop.f32.mrb[108].mxu0 }
 0x486   : > { %v2022_v28 = vadd.f32 %v3101_v45, %v3853_v0  ;;  %v2013_v29 = vpop.f32.mrb[109].mxu0 }
 0x487   : > { %v2014_v30 = vadd.f32 %v3853_v0, %v2013_v29  ;;  %v3102_v31 = vpop.f32.mrb[110].mxu0 }
 0x488   : > { %v2025_v32 = vadd.f32 %v3102_v31, %v3853_v0  ;;  %v2016_v33 = vpop.f32.mrb[111].mxu0  ;;  %v2118_v37 = vmax.f32 %v2022_v28, 0.0 }
 0x489   : > { %v2017_v36 = vadd.f32 %v3853_v0, %v2016_v33  ;;  %v2116_v38 = vmax.f32 %v2014_v30, 0.0 }
 0x48a   : > { %v2119_v35 = vmax.f32 %v2025_v32, 0.0 }
 0x48b   : > { %v2117_v39 = vmax.f32 %v2017_v36, 0.0 }
 0x48c   : > { %v2145_v40 = vpack.c.bf16 %v2119_v35, %v2118_v37 }
 0x48d   : > { %v2144_v41 = vpack.c.bf16 %v2117_v39, %v2116_v38 }
 0x48f   : > { %3133 = vmatprep.mubr.msk.bf16.mxu1 %vm2164_vm3, %v2144_v41 }
 0x490   : > { %3134 = vmatmul.mubr.msk.bf16.gmra.mrb[100].mxu1 %vm2164_vm3, %v2145_v40 }
 0x495   : > { %v3105_v42 = vpop.f32.mrb[112].mxu0 }
 0x496   : > { %v2038_v43 = vadd.f32 %v3105_v42, %v3853_v0  ;;  %v2029_v46 = vpop.f32.mrb[113].mxu0 }
 0x497   : > { %v2030_v47 = vadd.f32 %v3853_v0, %v2029_v46  ;;  %v3106_v48 = vpop.f32.mrb[114].mxu0 }
 0x498   : > { %v2041_v49 = vadd.f32 %v3106_v48, %v3853_v0  ;;  %v2032_v34 = vpop.f32.mrb[115].mxu0  ;;  %v2122_v51 = vmax.f32 %v2038_v43, 0.0 }
 0x499   : > { %v2033_v50 = vadd.f32 %v3853_v0, %v2032_v34  ;;  %v2120_v53 = vmax.f32 %v2030_v47, 0.0 }
 0x49a   : > { %v2123_v52 = vmax.f32 %v2041_v49, 0.0 }
 0x49b   : > { %v2121_v54 = vmax.f32 %v2033_v50, 0.0  ;;  %v3906_v50 = vld [vmem:[%s4025_s12] ss:$0 sm:$0xff] }
 0x49c   : > { %v2147_v55 = vpack.c.bf16 %v2123_v52, %v2122_v51 }
 0x49d   : > { %v2146_v56 = vpack.c.bf16 %v2121_v54, %v2120_v53 }
 0x49f   : > { %3137 = vmatprep.mubr.msk.bf16.mxu1 %vm2164_vm3, %v2146_v56 }
 0x4a0   : > { %3138 = vmatmul.mubr.msk.bf16.gmra.mrb[104].mxu1 %vm2164_vm3, %v2147_v55 }
 0x4a5   : > { %v3109_v57 = vpop.f32.mrb[116].mxu0 }
 0x4a6   : > { %v2054_v58 = vadd.f32 %v3109_v57, %v3853_v0  ;;  %v2045_v59 = vpop.f32.mrb[117].mxu0 }
 0x4a7   : > { %v2046_v60 = vadd.f32 %v3853_v0, %v2045_v59  ;;  %v3110_v61 = vpop.f32.mrb[118].mxu0 }
 0x4a8   : > { %v2057_v62 = vadd.f32 %v3110_v61, %v3853_v0  ;;  %v2048_v63 = vpop.f32.mrb[119].mxu0  ;;  %v2126_v2 = vmax.f32 %v2054_v58, 0.0 }
 0x4a9   : > { %v2049_v1 = vadd.f32 %v3853_v0, %v2048_v63  ;;  %v2124_v12 = vmax.f32 %v2046_v60, 0.0 }
 0x4aa   : > { %v2127_v3 = vmax.f32 %v2057_v62, 0.0 }
 0x4ab   : > { %v2125_v4 = vmax.f32 %v2049_v1, 0.0 }
 0x4ac   : > { %v2149_v5 = vpack.c.bf16 %v2127_v3, %v2126_v2 }
 0x4ad   : > { %v2148_v6 = vpack.c.bf16 %v2125_v4, %v2124_v12 }
 0x4af   : > { %3141 = vmatprep.mubr.msk.bf16.mxu1 %vm2164_vm3, %v2148_v6 }
 0x4b0   : > { %3142 = vmatmul.mubr.msk.bf16.gmra.mrb[108].mxu1 %vm2164_vm3, %v2149_v5 }
 0x4b5   : > { %v3113_v7 = vpop.f32.mrb[120].mxu0 }
 0x4b6   : > { %v2070_v8 = vadd.f32 %v3113_v7, %v3853_v0  ;;  %v2061_v9 = vpop.f32.mrb[121].mxu0 }
 0x4b7   : > { %v2062_v10 = vadd.f32 %v3853_v0, %v2061_v9  ;;  %v3114_v11 = vpop.f32.mrb[122].mxu0 }
 0x4b8   : > { %v2073_v13 = vadd.f32 %v3114_v11, %v3853_v0  ;;  %v2064_v14 = vpop.f32.mrb[123].mxu0  ;;  %v2130_v16 = vmax.f32 %v2070_v8, 0.0 }
 0x4b9   : > { %v2065_v15 = vadd.f32 %v3853_v0, %v2064_v14  ;;  %v2128_v18 = vmax.f32 %v2062_v10, 0.0 }
 0x4ba   : > { %v2131_v17 = vmax.f32 %v2073_v13, 0.0 }
 0x4bb   : > { %v2129_v24 = vmax.f32 %v2065_v15, 0.0 }
 0x4bc   : > { %v2151_v19 = vpack.c.bf16 %v2131_v17, %v2130_v16 }
 0x4bd   : > { %v2150_v20 = vpack.c.bf16 %v2129_v24, %v2128_v18 }
 0x4bf   : > { %3145 = vmatprep.mubr.msk.bf16.mxu1 %vm2164_vm3, %v2150_v20 }
 0x4c0   : > { %3146 = vmatmul.mubr.msk.bf16.gmra.mrb[112].mxu1 %vm2164_vm3, %v2151_v19 }
 0x4c5   : > { %v3117_v21 = vpop.f32.mrb[124].mxu0 }
 0x4c6   : > { %v2086_v22 = vadd.f32 %v3117_v21, %v3853_v0  ;;  %v2077_v23 = vpop.f32.mrb[125].mxu0 }
 0x4c7   : > { %v2078_v25 = vadd.f32 %v3853_v0, %v2077_v23  ;;  %v3118_v44 = vpop.f32.mrb[126].mxu0 }
 0x4c8   : > { %v2089_v26 = vadd.f32 %v3118_v44, %v3853_v0  ;;  %v2080_v27 = vpop.f32.mrb[127].mxu0  ;;  %v2134_v28 = vmax.f32 %v2086_v22, 0.0 }
 0x4c9   : > { %v2081_v45 = vadd.f32 %v3853_v0, %v2080_v27  ;;  %v2132_v30 = vmax.f32 %v2078_v25, 0.0 }
 0x4ca   : > { %v2135_v29 = vmax.f32 %v2089_v26, 0.0 }
 0x4cb   : > { %v2133_v31 = vmax.f32 %v2081_v45, 0.0 }
 0x4cc   : > { %v2153_v32 = vpack.c.bf16 %v2135_v29, %v2134_v28 }
 0x4cd   : > { %v2152_v33 = vpack.c.bf16 %v2133_v31, %v2132_v30 }
 0x4cf   : > { %3149 = vmatprep.mubr.msk.bf16.mxu1 %vm2164_vm3, %v2152_v33 }
 0x4d0   : > { %3150 = vmatmul.mubr.msk.bf16.gmra.mrb[116].mxu1 %vm2164_vm3, %v2153_v32 }
 0x4d5   : > { %v3121_v36 = vpop.f32.mrb[128].mxu0 }
 0x4d6   : > { %v2102_v37 = vadd.f32 %v3121_v36, %v3853_v0  ;;  %v2093_v35 = vpop.f32.mrb[129].mxu0 }
 0x4d7   : > { %v2094_v38 = vadd.f32 %v3853_v0, %v2093_v35  ;;  %v3122_v39 = vpop.f32.mrb[130].mxu0 }
 0x4d8   : > { %v2105_v40 = vadd.f32 %v3122_v39, %v3853_v0  ;;  %v2096_v41 = vpop.f32.mrb[131].mxu0  ;;  %v2138_v43 = vmax.f32 %v2102_v37, 0.0 }
 0x4d9   : > { %v2097_v42 = vadd.f32 %v3853_v0, %v2096_v41  ;;  %v2136_v47 = vmax.f32 %v2094_v38, 0.0 }
 0x4da   : > { %v2139_v46 = vmax.f32 %v2105_v40, 0.0 }
 0x4db   : > { %v2137_v48 = vmax.f32 %v2097_v42, 0.0 }
 0x4dc   : > { %v2155_v49 = vpack.c.bf16 %v2139_v46, %v2138_v43 }
 0x4dd   : > { %v2154_v34 = vpack.c.bf16 %v2137_v48, %v2136_v47 }
 0x4df   : > { %3153 = vmatprep.mubr.msk.bf16.mxu1 %vm2164_vm3, %v2154_v34 }
 0x4e0   : > { %3154 = vmatmul.mubr.msk.bf16.gmra.mrb[120].mxu1 %vm2164_vm3, %v2155_v49 }
 0x543   : > { %v3127_v51 = vpop.f32.mrb[92].mxu1 }
 0x544   : > { %v2260_v52 = vadd.f32 %v3127_v51, %v3906_v50  ;;  %v2251_v53 = vpop.f32.mrb[93].mxu1 }
 0x545   : > { %v2252_v0 = vadd.f32 %v3906_v50, %v2251_v53  ;;  %v3128_v54 = vpop.f32.mrb[94].mxu1 }
 0x546   : > { %v2794_v55 = vmul.f32 -1.442695, %v2260_v52  ;;  %v2263_v56 = vadd.f32 %v3128_v54, %v3906_v50  ;;  %v2254_v57 = vpop.f32.mrb[95].mxu1 }
 0x547   : > { %v2792_v58 = vmul.f32 -1.442695, %v2252_v0  ;;  %v2255_v59 = vadd.f32 %v3906_v50, %v2254_v57 }
 0x548   : > { %3239 = vpow2.f32 %v2794_v55  ;;  %v2795_v60 = vmul.f32 -1.442695, %v2263_v56 }
 0x549   : > { %3241 = vpow2.f32 %v2792_v58  ;;  %v2793_v61 = vmul.f32 -1.442695, %v2255_v59 }
 0x54a   : > { %3243 = vpow2.f32 %v2795_v60 }
 0x54b   : > { %3245 = vpow2.f32 %v2793_v61 }
 0x552   : > { %v3240_v62 = vpop.eup %3239 }
 0x553   : > { %v3242_v63 = vpop.eup %3241  ;;  %v2476_v1 = vadd.f32 1.0, %v3240_v62  ;;  %v3131_v2 = vpop.f32.mrb[96].mxu1 }
 0x554   : > { %v3244_v3 = vpop.eup %3243  ;;  %v2474_v12 = vadd.f32 1.0, %v3242_v63  ;;  %v2276_v4 = vadd.f32 %v3131_v2, %v3906_v50  ;;  %v2267_v5 = vpop.f32.mrb[97].mxu1 }
 0x555   : > { %v3246_v6 = vpop.eup %3245  ;;  %3247 = vrcp.f32 %v2476_v1  ;;  %v2477_v7 = vadd.f32 1.0, %v3244_v3  ;;  %v2268_v8 = vadd.f32 %v3906_v50, %v2267_v5  ;;  %v3132_v9 = vpop.f32.mrb[98].mxu1 }
 0x556   : > { %3249 = vrcp.f32 %v2474_v12  ;;  %v2475_v10 = vadd.f32 1.0, %v3246_v6  ;;  %v2798_v11 = vmul.f32 -1.442695, %v2276_v4  ;;  %v2279_v13 = vadd.f32 %v3132_v9, %v3906_v50  ;;  %v2270_v14 = vpop.f32.mrb[99].mxu1 }
 0x557   : > { %3251 = vrcp.f32 %v2477_v7  ;;  %v2796_v15 = vmul.f32 -1.442695, %v2268_v8  ;;  %v2271_v16 = vadd.f32 %v3906_v50, %v2270_v14 }
 0x558   : > { %3253 = vrcp.f32 %v2475_v10  ;;  %v2799_v17 = vmul.f32 -1.442695, %v2279_v13 }
 0x559   : > { %3255 = vpow2.f32 %v2798_v11  ;;  %v2797_v18 = vmul.f32 -1.442695, %v2271_v16 }
 0x55a   : > { %3257 = vpow2.f32 %v2796_v15 }
 0x55b   : > { %3259 = vpow2.f32 %v2799_v17 }
 0x55c   : > { %3261 = vpow2.f32 %v2797_v18 }
 0x55f   : > { %v3248_v24 = vpop.eup %3247 }
 0x560   : > { %v3250_v19 = vpop.eup %3249  ;;  %2572 = vst.msk [vmem:[%s3920_s22 + $0x10] sm:$0xff] %vm2164_vm3, %v3248_v24 }
 0x561   : > { %v3252_v20 = vpop.eup %3251  ;;  %2570 = vst.msk [vmem:[%s3920_s22] sm:$0xff] %vm2164_vm3, %v3250_v19 }
 0x562   : > { %v3254_v21 = vpop.eup %3253  ;;  %2573 = vst.msk [vmem:[%s3920_s22 + $0x18] sm:$0xff] %vm2164_vm3, %v3252_v20 }
 0x563   : > { %v3256_v22 = vpop.eup %3255  ;;  %2571 = vst.msk [vmem:[%s3920_s22 + $0x8] sm:$0xff] %vm2164_vm3, %v3254_v21  ;;  %v3135_v23 = vpop.f32.mrb[100].mxu1 }
 0x564   : > { %v3258_v25 = vpop.eup %3257  ;;  %v2480_v44 = vadd.f32 1.0, %v3256_v22  ;;  %v2292_v26 = vadd.f32 %v3135_v23, %v3906_v50  ;;  %v2283_v27 = vpop.f32.mrb[101].mxu1 }
 0x565   : > { %v3260_v45 = vpop.eup %3259  ;;  %v2478_v28 = vadd.f32 1.0, %v3258_v25  ;;  %v2284_v29 = vadd.f32 %v3906_v50, %v2283_v27  ;;  %v3136_v30 = vpop.f32.mrb[102].mxu1 }
 0x566   : > { %v3262_v31 = vpop.eup %3261  ;;  %3263 = vrcp.f32 %v2480_v44  ;;  %v2481_v32 = vadd.f32 1.0, %v3260_v45  ;;  %v2802_v33 = vmul.f32 -1.442695, %v2292_v26  ;;  %v2295_v36 = vadd.f32 %v3136_v30, %v3906_v50  ;;  %v2286_v37 = vpop.f32.mrb[103].mxu1 }
 0x567   : > { %3265 = vrcp.f32 %v2478_v28  ;;  %v2479_v35 = vadd.f32 1.0, %v3262_v31  ;;  %v2800_v38 = vmul.f32 -1.442695, %v2284_v29  ;;  %v2287_v39 = vadd.f32 %v3906_v50, %v2286_v37 }
 0x568   : > { %3267 = vrcp.f32 %v2481_v32  ;;  %v2803_v40 = vmul.f32 -1.442695, %v2295_v36 }
 0x569   : > { %3269 = vrcp.f32 %v2479_v35  ;;  %v2801_v41 = vmul.f32 -1.442695, %v2287_v39 }
 0x56a   : > { %3271 = vpow2.f32 %v2802_v33 }
 0x56b   : > { %3273 = vpow2.f32 %v2800_v38 }
 0x56c   : > { %3275 = vpow2.f32 %v2803_v40 }
 0x56d   : > { %3277 = vpow2.f32 %v2801_v41 }
 0x570   : > { %v3264_v42 = vpop.eup %3263 }
 0x571   : > { %v3266_v43 = vpop.eup %3265  ;;  %2576 = vst.msk [vmem:[%s3920_s22 + $0x30] sm:$0xff] %vm2164_vm3, %v3264_v42 }
 0x572   : > { %v3268_v46 = vpop.eup %3267  ;;  %2574 = vst.msk [vmem:[%s3920_s22 + $0x20] sm:$0xff] %vm2164_vm3, %v3266_v43 }
 0x573   : > { %v3270_v47 = vpop.eup %3269  ;;  %2577 = vst.msk [vmem:[%s3920_s22 + $0x38] sm:$0xff] %vm2164_vm3, %v3268_v46  ;;  %v3139_v48 = vpop.f32.mrb[104].mxu1 }
 0x574   : > { %v3272_v49 = vpop.eup %3271  ;;  %2575 = vst.msk [vmem:[%s3920_s22 + $0x28] sm:$0xff] %vm2164_vm3, %v3270_v47  ;;  %v2308_v34 = vadd.f32 %v3139_v48, %v3906_v50  ;;  %v2299_v51 = vpop.f32.mrb[105].mxu1 }
 0x575   : > { %v3274_v52 = vpop.eup %3273  ;;  %v2484_v53 = vadd.f32 1.0, %v3272_v49  ;;  %v2300_v0 = vadd.f32 %v3906_v50, %v2299_v51  ;;  %v3140_v54 = vpop.f32.mrb[106].mxu1 }
 0x576   : > { %v3276_v55 = vpop.eup %3275  ;;  %v2482_v56 = vadd.f32 1.0, %v3274_v52  ;;  %v2311_v57 = vadd.f32 %v3140_v54, %v3906_v50  ;;  %v2302_v58 = vpop.f32.mrb[107].mxu1  ;;  %v2806_v61 = vmul.f32 -1.442695, %v2308_v34 }
 0x577   : > { %v3278_v59 = vpop.eup %3277  ;;  %3279 = vrcp.f32 %v2484_v53  ;;  %v2485_v60 = vadd.f32 1.0, %v3276_v55  ;;  %v2303_v62 = vadd.f32 %v3906_v50, %v2302_v58  ;;  %v2804_v1 = vmul.f32 -1.442695, %v2300_v0 }
 0x578   : > { %3281 = vrcp.f32 %v2482_v56  ;;  %v2483_v63 = vadd.f32 1.0, %v3278_v59  ;;  %v2807_v2 = vmul.f32 -1.442695, %v2311_v57 }
 0x579   : > { %3283 = vrcp.f32 %v2485_v60  ;;  %v2805_v3 = vmul.f32 -1.442695, %v2303_v62 }
 0x57a   : > { %3285 = vrcp.f32 %v2483_v63 }
 0x57b   : > { %3287 = vpow2.f32 %v2806_v61 }
 0x57c   : > { %3289 = vpow2.f32 %v2804_v1 }
 0x57d   : > { %3291 = vpow2.f32 %v2807_v2 }
 0x57e   : > { %3293 = vpow2.f32 %v2805_v3 }
 0x581   : > { %v3280_v12 = vpop.eup %3279 }
 0x582   : > { %v3282_v4 = vpop.eup %3281  ;;  %2580 = vst.msk [vmem:[%s3920_s22 + $0x50] sm:$0xff] %vm2164_vm3, %v3280_v12 }
 0x583   : > { %v3284_v5 = vpop.eup %3283  ;;  %2578 = vst.msk [vmem:[%s3920_s22 + $0x40] sm:$0xff] %vm2164_vm3, %v3282_v4  ;;  %v3143_v6 = vpop.f32.mrb[108].mxu1 }
 0x584   : > { %v3286_v7 = vpop.eup %3285  ;;  %2581 = vst.msk [vmem:[%s3920_s22 + $0x58] sm:$0xff] %vm2164_vm3, %v3284_v5  ;;  %v2324_v8 = vadd.f32 %v3143_v6, %v3906_v50  ;;  %v2315_v9 = vpop.f32.mrb[109].mxu1 }
 0x585   : > { %v3288_v10 = vpop.eup %3287  ;;  %2579 = vst.msk [vmem:[%s3920_s22 + $0x48] sm:$0xff] %vm2164_vm3, %v3286_v7  ;;  %v2316_v11 = vadd.f32 %v3906_v50, %v2315_v9  ;;  %v3144_v13 = vpop.f32.mrb[110].mxu1 }
 0x586   : > { %v3290_v14 = vpop.eup %3289  ;;  %v2488_v15 = vadd.f32 1.0, %v3288_v10  ;;  %v2327_v16 = vadd.f32 %v3144_v13, %v3906_v50  ;;  %v2318_v17 = vpop.f32.mrb[111].mxu1  ;;  %v2810_v22 = vmul.f32 -1.442695, %v2324_v8 }
 0x587   : > { %v3292_v18 = vpop.eup %3291  ;;  %v2486_v24 = vadd.f32 1.0, %v3290_v14  ;;  %v2319_v19 = vadd.f32 %v3906_v50, %v2318_v17  ;;  %v2808_v25 = vmul.f32 -1.442695, %v2316_v11 }
 0x588   : > { %v3294_v20 = vpop.eup %3293  ;;  %3295 = vrcp.f32 %v2488_v15  ;;  %v2489_v21 = vadd.f32 1.0, %v3292_v18  ;;  %v2811_v44 = vmul.f32 -1.442695, %v2327_v16 }
 0x589   : > { %3297 = vrcp.f32 %v2486_v24  ;;  %v2487_v23 = vadd.f32 1.0, %v3294_v20  ;;  %v2809_v26 = vmul.f32 -1.442695, %v2319_v19 }
 0x58a   : > { %3299 = vrcp.f32 %v2489_v21 }
 0x58b   : > { %3301 = vrcp.f32 %v2487_v23 }
 0x58c   : > { %3303 = vpow2.f32 %v2810_v22 }
 0x58d   : > { %3305 = vpow2.f32 %v2808_v25 }
 0x58e   : > { %3307 = vpow2.f32 %v2811_v44 }
 0x58f   : > { %3309 = vpow2.f32 %v2809_v26 }
 0x592   : > { %v3296_v27 = vpop.eup %3295 }
 0x593   : > { %v3298_v45 = vpop.eup %3297  ;;  %2584 = vst.msk [vmem:[%s3920_s22 + $0x70] sm:$0xff] %vm2164_vm3, %v3296_v27  ;;  %v3147_v28 = vpop.f32.mrb[112].mxu1 }
 0x594   : > { %v3300_v29 = vpop.eup %3299  ;;  %2582 = vst.msk [vmem:[%s3920_s22 + $0x60] sm:$0xff] %vm2164_vm3, %v3298_v45  ;;  %v2340_v30 = vadd.f32 %v3147_v28, %v3906_v50  ;;  %v2331_v31 = vpop.f32.mrb[113].mxu1 }
 0x595   : > { %v3302_v32 = vpop.eup %3301  ;;  %2585 = vst.msk [vmem:[%s3920_s22 + $0x78] sm:$0xff] %vm2164_vm3, %v3300_v29  ;;  %v2332_v33 = vadd.f32 %v3906_v50, %v2331_v31  ;;  %v3148_v36 = vpop.f32.mrb[114].mxu1 }
 0x596   : > { %v3304_v37 = vpop.eup %3303  ;;  %2583 = vst.msk [vmem:[%s3920_s22 + $0x68] sm:$0xff] %vm2164_vm3, %v3302_v32  ;;  %v2814_v35 = vmul.f32 -1.442695, %v2340_v30  ;;  %v2343_v38 = vadd.f32 %v3148_v36, %v3906_v50  ;;  %v2334_v39 = vpop.f32.mrb[115].mxu1 }
 0x597   : > { %v3306_v40 = vpop.eup %3305  ;;  %v2492_v41 = vadd.f32 1.0, %v3304_v37  ;;  %v2335_v42 = vadd.f32 %v3906_v50, %v2334_v39  ;;  %v2812_v49 = vmul.f32 -1.442695, %v2332_v33 }
 0x598   : > { %v3308_v43 = vpop.eup %3307  ;;  %v2490_v46 = vadd.f32 1.0, %v3306_v40  ;;  %3311 = vpow2.f32 %v2814_v35  ;;  %v2815_v51 = vmul.f32 -1.442695, %v2343_v38 }
 0x599   : > { %v3310_v47 = vpop.eup %3309  ;;  %3313 = vrcp.f32 %v2492_v41  ;;  %v2493_v48 = vadd.f32 1.0, %v3308_v43  ;;  %v2813_v52 = vmul.f32 -1.442695, %v2335_v42 }
 0x59a   : > { %3315 = vrcp.f32 %v2490_v46  ;;  %v2491_v34 = vadd.f32 1.0, %v3310_v47 }
 0x59b   : > { %3317 = vrcp.f32 %v2493_v48 }
 0x59c   : > { %3319 = vrcp.f32 %v2491_v34 }
 0x59d   : > { %3321 = vpow2.f32 %v2812_v49 }
 0x59e   : > { %3323 = vpow2.f32 %v2815_v51 }
 0x59f   : > { %3325 = vpow2.f32 %v2813_v52 }
 0x5a2   : > { %v3312_v53 = vpop.eup %3311 }
 0x5a3   : > { %v3314_v0 = vpop.eup %3313  ;;  %v2496_v54 = vadd.f32 1.0, %v3312_v53  ;;  %v3151_v55 = vpop.f32.mrb[116].mxu1 }
 0x5a4   : > { %v3316_v56 = vpop.eup %3315  ;;  %2588 = vst.msk [vmem:[%s3920_s22 + $0x90] sm:$0xff] %vm2164_vm3, %v3314_v0  ;;  %v2356_v57 = vadd.f32 %v3151_v55, %v3906_v50  ;;  %v2347_v58 = vpop.f32.mrb[117].mxu1 }
 0x5a5   : > { %v3318_v59 = vpop.eup %3317  ;;  %2586 = vst.msk [vmem:[%s3920_s22 + $0x80] sm:$0xff] %vm2164_vm3, %v3316_v56  ;;  %3327 = vrcp.f32 %v2496_v54  ;;  %v2348_v60 = vadd.f32 %v3906_v50, %v2347_v58  ;;  %v3152_v61 = vpop.f32.mrb[118].mxu1 }
 0x5a6   : > { %v3320_v62 = vpop.eup %3319  ;;  %2589 = vst.msk [vmem:[%s3920_s22 + $0x98] sm:$0xff] %vm2164_vm3, %v3318_v59  ;;  %v2818_v63 = vmul.f32 -1.442695, %v2356_v57  ;;  %v2359_v1 = vadd.f32 %v3152_v61, %v3906_v50  ;;  %v2350_v2 = vpop.f32.mrb[119].mxu1 }
 0x5a7   : > { %v3322_v3 = vpop.eup %3321  ;;  %2587 = vst.msk [vmem:[%s3920_s22 + $0x88] sm:$0xff] %vm2164_vm3, %v3320_v62  ;;  %v2816_v12 = vmul.f32 -1.442695, %v2348_v60  ;;  %v2351_v4 = vadd.f32 %v3906_v50, %v2350_v2 }
 0x5a8   : > { %v3324_v5 = vpop.eup %3323  ;;  %v2494_v6 = vadd.f32 1.0, %v3322_v3  ;;  %3329 = vpow2.f32 %v2818_v63  ;;  %v2819_v9 = vmul.f32 -1.442695, %v2359_v1 }
 0x5a9   : > { %v3326_v7 = vpop.eup %3325  ;;  %v2497_v8 = vadd.f32 1.0, %v3324_v5  ;;  %3331 = vpow2.f32 %v2816_v12  ;;  %v2817_v11 = vmul.f32 -1.442695, %v2351_v4 }
 0x5aa   : > { %3333 = vrcp.f32 %v2494_v6  ;;  %v2495_v10 = vadd.f32 1.0, %v3326_v7 }
 0x5ab   : > { %3335 = vrcp.f32 %v2497_v8 }
 0x5ac   : > { %3337 = vrcp.f32 %v2495_v10 }
 0x5ad   : > { %3339 = vpow2.f32 %v2819_v9 }
 0x5ae   : > { %3341 = vpow2.f32 %v2817_v11 }
 0x5af   : > { %v3328_v13 = vpop.eup %3327 }
 0x5b0   : > { %2592 = vst.msk [vmem:[%s3920_s22 + $0xb0] sm:$0xff] %vm2164_vm3, %v3328_v13 }
 0x5b2   : > { %v3330_v14 = vpop.eup %3329 }
 0x5b3   : > { %v3332_v15 = vpop.eup %3331  ;;  %v2500_v16 = vadd.f32 1.0, %v3330_v14  ;;  %v3155_v17 = vpop.f32.mrb[120].mxu1 }
 0x5b4   : > { %v3334_v18 = vpop.eup %3333  ;;  %v2498_v24 = vadd.f32 1.0, %v3332_v15  ;;  %v2372_v19 = vadd.f32 %v3155_v17, %v3906_v50  ;;  %v2363_v20 = vpop.f32.mrb[121].mxu1 }
 0x5b5   : > { %v3336_v21 = vpop.eup %3335  ;;  %2590 = vst.msk [vmem:[%s3920_s22 + $0xa0] sm:$0xff] %vm2164_vm3, %v3334_v18  ;;  %3343 = vrcp.f32 %v2500_v16  ;;  %v2364_v22 = vadd.f32 %v3906_v50, %v2363_v20  ;;  %v3156_v23 = vpop.f32.mrb[122].mxu1 }
 0x5b6   : > { %v3338_v25 = vpop.eup %3337  ;;  %2593 = vst.msk [vmem:[%s3920_s22 + $0xb8] sm:$0xff] %vm2164_vm3, %v3336_v21  ;;  %3345 = vrcp.f32 %v2498_v24  ;;  %v2822_v44 = vmul.f32 -1.442695, %v2372_v19  ;;  %v2375_v26 = vadd.f32 %v3156_v23, %v3906_v50  ;;  %v2366_v27 = vpop.f32.mrb[123].mxu1 }
 0x5b7   : > { %v3340_v45 = vpop.eup %3339  ;;  %2591 = vst.msk [vmem:[%s3920_s22 + $0xa8] sm:$0xff] %vm2164_vm3, %v3338_v25  ;;  %v2820_v28 = vmul.f32 -1.442695, %v2364_v22  ;;  %v2367_v29 = vadd.f32 %v3906_v50, %v2366_v27 }
 0x5b8   : > { %v3342_v30 = vpop.eup %3341  ;;  %v2501_v31 = vadd.f32 1.0, %v3340_v45  ;;  %3347 = vpow2.f32 %v2822_v44  ;;  %v2823_v32 = vmul.f32 -1.442695, %v2375_v26 }
 0x5b9   : > { %v2499_v33 = vadd.f32 1.0, %v3342_v30  ;;  %3349 = vpow2.f32 %v2820_v28  ;;  %v2821_v36 = vmul.f32 -1.442695, %v2367_v29 }
 0x5ba   : > { %3351 = vrcp.f32 %v2501_v31 }
 0x5bb   : > { %3353 = vrcp.f32 %v2499_v33 }
 0x5bc   : > { %3355 = vpow2.f32 %v2823_v32 }
 0x5bd   : > { %3357 = vpow2.f32 %v2821_v36 }
 0x5bf   : > { %v3344_v37 = vpop.eup %3343 }
 0x5c0   : > { %v3346_v35 = vpop.eup %3345  ;;  %2596 = vst.msk [vmem:[%s3920_s22 + $0xd0] sm:$0xff] %vm2164_vm3, %v3344_v37 }
 0x5c1   : > { %2594 = vst.msk [vmem:[%s3920_s22 + $0xc0] sm:$0xff] %vm2164_vm3, %v3346_v35 }
 0x5c2   : > { %v3348_v50 = vpop.eup %3347 }
 0x5c3   : > { %v3350_v38 = vpop.eup %3349  ;;  %v2504_v39 = vadd.f32 1.0, %v3348_v50 }
 0x5c4   : > { %v3352_v40 = vpop.eup %3351  ;;  %v2502_v41 = vadd.f32 1.0, %v3350_v38 }
 0x5c5   : > { %v3354_v42 = vpop.eup %3353  ;;  %2597 = vst.msk [vmem:[%s3920_s22 + $0xd8] sm:$0xff] %vm2164_vm3, %v3352_v40  ;;  %3359 = vrcp.f32 %v2504_v39 }
 0x5c6   : > { %v3356_v43 = vpop.eup %3355  ;;  %2595 = vst.msk [vmem:[%s3920_s22 + $0xc8] sm:$0xff] %vm2164_vm3, %v3354_v42  ;;  %3361 = vrcp.f32 %v2502_v41 }
 0x5c7   : > { %v3358_v46 = vpop.eup %3357  ;;  %v2505_v47 = vadd.f32 1.0, %v3356_v43 }
 0x5c8   : > { %v2503_v48 = vadd.f32 1.0, %v3358_v46 }
 0x5c9   : > { %3363 = vrcp.f32 %v2505_v47 }
 0x5ca   : > { %3365 = vrcp.f32 %v2503_v48 }
 0x5cf   : > { %v3360_v49 = vpop.eup %3359 }
 0x5d0   : > { %v3362_v34 = vpop.eup %3361  ;;  %2600 = vst.msk [vmem:[%s3920_s22 + $0xf0] sm:$0xff] %vm2164_vm3, %v3360_v49 }
 0x5d1   : > { %2598 = vst.msk [vmem:[%s3920_s22 + $0xe0] sm:$0xff] %vm2164_vm3, %v3362_v34 }
 0x5d3   : > { %v3364_v51 = vpop.eup %3363 }
 0x5d4   : > { %v3366_v52 = vpop.eup %3365  ;;  %2601 = vst.msk [vmem:[%s3920_s22 + $0xf8] sm:$0xff] %vm2164_vm3, %v3364_v51 }
 0x5d5   : > { %2599 = vst.msk [vmem:[%s3920_s22 + $0xe8] sm:$0xff] %vm2164_vm3, %v3366_v52 }
 0x5d6 PF: > { %s23_s25 = sadd.s32 1, %s3373_s25  }
 0x5d7   : > { %p20_p4 = scmp.ge.s32.totalorder %s23_s25, 4  }
 0x5d9   :  { %22 = sbr.rel (!%p20_p4) target bundleno = 1 (0x1), region = 102 }

</bundles_post_ra>
